<compile_context>
chip_gen: v5e
topology: v5e:2x2
jax: 0.10.0
libtpu: 0.0.40
codegen_flags: <defaults>
</compile_context>

<pallas_src>
import functools

import numpy as np
import jax
import jax.numpy as jnp
from jax import lax
from jax.experimental import pallas as pl
from jax.experimental.pallas import tpu as pltpu


def _round_up(x, m):
    return (x + m - 1) // m * m


def lstm_fc_kernel(gx_ref, whh_ref, wfc_ref, bfc_ref, out_ref, h_sc, c_sc,
                   *, seq_len, needs_mask, num_out):
    """One grid step = t_blk time steps of the recurrence for one batch block.

    gx_ref : (t_blk, b_blk, 4H) bf16  precomputed x_t @ W_ih^T + (b_ih + b_hh), time-major
    whh_ref: (H, 4H)            f32   recurrent weights, resident
    wfc_ref: (H, O_pad)         f32   classifier weights (zero-padded to 128 lanes), resident
    bfc_ref: (1, O_pad)         f32   classifier bias (zero-padded)
    out_ref: (b_blk, O_pad)     f32   softmax output, written on the last time block
    h_sc/c_sc: (b_blk, H)       f32   state, persists across the (arbitrary) time axis
    """
    t_idx = pl.program_id(1)
    t_blk = gx_ref.shape[0]
    b_blk, H = h_sc.shape

    # init hidden / cell state (hidden_0 / cell_0 = zeros) at the start of each batch block
    @pl.when(t_idx == 0)
    def _():
        h_sc[...] = jnp.zeros_like(h_sc)
        c_sc[...] = jnp.zeros_like(c_sc)

    t0 = t_idx * t_blk

    # ---- hoisted loop invariants (outside the unrolled recurrence) ----
    whh = whh_ref[...]                                            # (H, 4H) f32

    # Fused gate nonlinearity: act = a * tanh(a * gates) + b with per-lane
    #   a = 0.5 for i/f/o gates, 1.0 for the g gate;  b = 0.5 for i/f/o, 0.0 for g
    # => sigmoid for i/f/o, tanh for g, in a single EUP push over (b_blk, 4H).
    lane = lax.broadcasted_iota(jnp.int32, (b_blk, 4 * H), 1)
    is_g = (lane >= 2 * H) & (lane < 3 * H)
    pre_s = jnp.where(is_g, 1.0, 0.5).astype(jnp.float32)
    aff_b = jnp.where(is_g, 0.0, 0.5).astype(jnp.float32)

    def make_step(masked):
        def step(s, carry):
            h, c = carry
            # recurrent matmul only (input projection already folded into gx), f32 acc
            gates = gx_ref[s].astype(jnp.float32) + jnp.dot(
                h, whh, preferred_element_type=jnp.float32)
            act = pre_s * jnp.tanh(gates * pre_s) + aff_b         # [i, f, g, o] activations
            i_g = act[:, 0 * H:1 * H]
            f_g = act[:, 1 * H:2 * H]
            g_g = act[:, 2 * H:3 * H]
            o_g = act[:, 3 * H:4 * H]
            c_new = f_g * c + i_g * g_g
            h_new = o_g * jnp.tanh(c_new)
            if masked:
                keep = (t0 + s) < seq_len
                h_new = jnp.where(keep, h_new, h)
                c_new = jnp.where(keep, c_new, c)
            return h_new, c_new
        return step

    def run_block(masked):
        h, c = lax.fori_loop(0, t_blk, make_step(masked), (h_sc[...], c_sc[...]),
                             unroll=min(t_blk, 8))
        h_sc[...] = h
        c_sc[...] = c

    if needs_mask:
        is_full = (t0 + t_blk) <= seq_len

        @pl.when(is_full)
        def _():
            run_block(False)        # full blocks: no per-step select

        @pl.when(jnp.logical_not(is_full))
        def _():
            run_block(True)         # only the final partial block pays for masking
    else:
        run_block(False)

    # last time block: FC on the final hidden state, then softmax over the class dim
    @pl.when(t_idx == pl.num_programs(1) - 1)
    def _():
        h_fin = h_sc[...]
        logits = jnp.dot(h_fin, wfc_ref[...],
                         preferred_element_type=jnp.float32) + bfc_ref[...]
        col = lax.broadcasted_iota(jnp.int32, logits.shape, 1)
        logits = jnp.where(col < num_out, logits, -1e30)          # kill padded classes
        m = jnp.max(logits, axis=1, keepdims=True)
        e = jnp.exp(logits - m)
        out_ref[...] = (e / jnp.sum(e, axis=1, keepdims=True)).astype(out_ref.dtype)


def lstm_with_fc(x, w_ih, w_hh, b_ih, b_hh, w_fc, b_fc, *, t_blk=16):
    """x: (B, T, F) batch_first, like the PyTorch module. Returns (B, out_dim)."""
    B, T, F = x.shape
    H = w_hh.shape[1]          # w_hh: (4H, H)
    O = w_fc.shape[0]          # w_fc: (O, H)
    O_pad = _round_up(max(O, 128), 128)

    # --- weights: pre-transpose once, keep f32 (MXU default precision handles bf16 passes) ---
    wih_t = jnp.transpose(w_ih).astype(jnp.float32)     # (F, 4H)
    whh_t = jnp.transpose(w_hh).astype(jnp.float32)     # (H, 4H)
    wfc_t = jnp.transpose(w_fc).astype(jnp.float32)     # (H, O)
    wfc_t = jnp.pad(wfc_t, ((0, 0), (0, O_pad - O)))    # lane-dense classifier block
    bfc = jnp.pad(b_fc.reshape(1, O).astype(jnp.float32), ((0, 0), (0, O_pad - O)))
    b = (b_ih + b_hh).astype(jnp.float32)               # (4H,)  fused once, outside the loop

    # --- hoist the input projection out of the recurrence: one big matmul over all T*B rows,
    #     emitted time-major with the bias folded in; stream it to the kernel in bf16 ---
    gate_x = jnp.einsum('btf,fg->tbg', x.astype(jnp.float32), wih_t) + b[None, None, :]
    gate_x = gate_x.astype(jnp.bfloat16)                # (T, B, 4H)

    # --- batch tiling: pad to sublanes; split into >=2 blocks for B>=16 so v7x's second
    #     TensorCore gets work; cap block rows at 128 (one MXU pass on v5e) ---
    B8 = max(_round_up(B, 8), 8)
    if B8 >= 16:
        b_blk = min(128, _round_up((B8 + 1) // 2, 8))
    else:
        b_blk = B8
    B_pad = _round_up(B8, b_blk)

    # --- time blocking: amortize the ~600-cycle per-grid-step overhead; keep the
    #     double-buffered bf16 gate_x tile <= ~8 MiB so it also fits v7x's 64 MiB VMEM ---
    t_blk = max(1, min(t_blk, T))
    while t_blk > 1 and 2 * t_blk * b_blk * 4 * H * 2 > (8 << 20):
        t_blk //= 2
    T_pad = _round_up(T, t_blk)
    needs_mask = (T_pad != T)

    gate_x = jnp.pad(gate_x, ((0, T_pad - T), (0, B_pad - B), (0, 0)))

    grid = (B_pad // b_blk, T_pad // t_blk)             # (batch blocks, time blocks)

    kernel = functools.partial(lstm_fc_kernel, seq_len=T, needs_mask=needs_mask, num_out=O)

    # VMEM requirement: double-buffered gate_x tile + resident weights/bias + out + h/c scratch
    est = (2 * t_blk * b_blk * 4 * H * 2      # gate_x tile (bf16, double-buffered)
           + 2 * H * 4 * H * 4                # W_hh^T
           + 2 * H * O_pad * 4                # W_fc^T
           + 2 * O_pad * 4                    # b_fc
           + 2 * b_blk * O_pad * 4            # output tile
           + 2 * b_blk * H * 4)               # h/c scratch
    vmem_limit = int(min(48 << 20, max(16 << 20, 2 * est + (4 << 20))))

    out = pl.pallas_call(
        kernel,
        out_shape=jax.ShapeDtypeStruct((B_pad, O_pad), jnp.float32),
        grid_spec=pltpu.PrefetchScalarGridSpec(
            num_scalar_prefetch=0,
            grid=grid,
            in_specs=[
                pl.BlockSpec((t_blk, b_blk, 4 * H), lambda bi, ti: (ti, bi, 0)),  # gate_x tile
                pl.BlockSpec((H, 4 * H), lambda bi, ti: (0, 0)),                  # W_hh^T (resident)
                pl.BlockSpec((H, O_pad), lambda bi, ti: (0, 0)),                  # W_fc^T (resident)
                pl.BlockSpec((1, O_pad), lambda bi, ti: (0, 0)),                  # b_fc
            ],
            out_specs=pl.BlockSpec((b_blk, O_pad), lambda bi, ti: (bi, 0)),       # resident output
            scratch_shapes=[
                pltpu.VMEM((b_blk, H), jnp.float32),   # h state
                pltpu.VMEM((b_blk, H), jnp.float32),   # c state
            ],
        ),
        compiler_params=pltpu.CompilerParams(
            dimension_semantics=("parallel", "arbitrary"),   # batch parallel, time sequential
            vmem_limit_bytes=vmem_limit,
        ),
    )(gate_x, whh_t, wfc_t, bfc)

    return out[:B, :O]


def reference(x, w_ih, w_hh, b_ih, b_hh, w_fc, b_fc):
    """Pure-JAX f32 reference matching nn.LSTM + nn.Linear + Softmax(dim=1)."""
    B, T, F = x.shape
    H = w_hh.shape[1]

    def step(carry, x_t):
        h, c = carry
        gates = x_t @ w_ih.T + b_ih + h @ w_hh.T + b_hh
        i = jax.nn.sigmoid(gates[:, 0 * H:1 * H])
        f = jax.nn.sigmoid(gates[:, 1 * H:2 * H])
        g = jnp.tanh(gates[:, 2 * H:3 * H])
        o = jax.nn.sigmoid(gates[:, 3 * H:4 * H])
        c = f * c + i * g
        h = o * jnp.tanh(c)
        return (h, c), None

    h0 = jnp.zeros((B, H), jnp.float32)
    c0 = jnp.zeros((B, H), jnp.float32)
    (h_n, _), _ = jax.lax.scan(step, (h0, c0), jnp.transpose(x, (1, 0, 2)))
    logits = h_n @ w_fc.T + b_fc
    return jax.nn.softmax(logits, axis=1)


if __name__ == "__main__":
    # small shapes; H/F/O follow the module defaults (hidden_dim=128, feature_size=28, out_dim=5)
    B, T, F = 2, 8, 28
    H, O = 128, 5

    key = jax.random.PRNGKey(0)
    keys = jax.random.split(key, 7)
    scale = float(1.0 / np.sqrt(H))   # PyTorch default uniform(-1/sqrt(H), 1/sqrt(H))

    x = jax.random.normal(keys[0], (B, T, F), jnp.float32)
    w_ih = jax.random.uniform(keys[1], (4 * H, F), jnp.float32, -scale, scale)
    w_hh = jax.random.uniform(keys[2], (4 * H, H), jnp.float32, -scale, scale)
    b_ih = jax.random.uniform(keys[3], (4 * H,), jnp.float32, -scale, scale)
    b_hh = jax.random.uniform(keys[4], (4 * H,), jnp.float32, -scale, scale)
    w_fc = jax.random.uniform(keys[5], (O, H), jnp.float32, -scale, scale)
    b_fc = jax.random.uniform(keys[6], (O,), jnp.float32, -scale, scale)

    out = lstm_with_fc(x, w_ih, w_hh, b_ih, b_hh, w_fc, b_fc)
    out = jax.block_until_ready(out)

    ref = reference(x, w_ih, w_hh, b_ih, b_hh, w_fc, b_fc)
    assert out.shape == (B, O)
    # bf16 gate_x stream + MXU bf16 passes -> looser tolerance vs the pure-f32 reference
    assert jnp.allclose(out, ref, atol=2e-2, rtol=2e-2), (out, ref)

    print("KERNEL_OK")
</pallas_src>

<mosaic_0001>
module attributes {stable_mosaic.version = 11 : i64} {
  func.func @lstm_fc_kernel(%arg0: i32, %arg1: i32, %arg2: memref<8x8x512xbf16, #tpu.memory_space<vmem>>, %arg3: memref<128x512xf32, #tpu.memory_space<vmem>>, %arg4: memref<128x128xf32, #tpu.memory_space<vmem>>, %arg5: memref<1x128xf32, #tpu.memory_space<vmem>>, %arg6: memref<8x128xf32, #tpu.memory_space<vmem>>, %arg7: memref<8x128xf32, #tpu.memory_space<vmem>>, %arg8: memref<8x128xf32, #tpu.memory_space<vmem>>) attributes {dimension_semantics = [#tpu.dimension_semantics<parallel>, #tpu.dimension_semantics<arbitrary>], iteration_bounds = array<i64: 1, 1>, scalar_prefetch = 0 : i64, scratch_operands = 2 : i64, tpu.core_type = #tpu.core_type<tc>, window_params = [{transform_indices = @transform_0, window_bounds = array<i64: 8, 8, 512>}, {pipeline_mode = #tpu.pipeline_mode<synchronous>, transform_indices = @transform_1, window_bounds = array<i64: 128, 512>}, {pipeline_mode = #tpu.pipeline_mode<synchronous>, transform_indices = @transform_2, window_bounds = array<i64: 128, 128>}, {pipeline_mode = #tpu.pipeline_mode<synchronous>, transform_indices = @transform_3, window_bounds = array<i64: 1, 128>}, {transform_indices = @transform_4, window_bounds = array<i64: 8, 128>}]} {
    %c0_i32 = arith.constant 0 : i32
    %0 = arith.cmpi eq, %arg1, %c0_i32 : i32
    %1 = arith.extui %0 : i1 to i32
    %c0_i32_0 = arith.constant 0 : i32
    %2 = arith.cmpi ne, %1, %c0_i32_0 : i32
    scf.if %2 {
      %cst_40 = arith.constant 0.000000e+00 : f32
      %175 = vector.broadcast %cst_40 : f32 to vector<8x128xf32>
      %c0_41 = arith.constant 0 : index
      %c0_42 = arith.constant 0 : index
      %176 = vector.load %arg7[%c0_41, %c0_42] : memref<8x128xf32, #tpu.memory_space<vmem>>, vector<8x128xf32>
      tpu.vector_store %arg7[%c0_41, %c0_42], %175 {strides = array<i32>} : memref<8x128xf32, #tpu.memory_space<vmem>>, vector<8x128xf32>,
      %cst_43 = arith.constant 0.000000e+00 : f32
      %177 = vector.broadcast %cst_43 : f32 to vector<8x128xf32>
      %c0_44 = arith.constant 0 : index
      %c0_45 = arith.constant 0 : index
      %178 = vector.load %arg8[%c0_44, %c0_45] : memref<8x128xf32, #tpu.memory_space<vmem>>, vector<8x128xf32>
      tpu.vector_store %arg8[%c0_44, %c0_45], %177 {strides = array<i32>} : memref<8x128xf32, #tpu.memory_space<vmem>>, vector<8x128xf32>,
    } else {
    }
    %c0 = arith.constant 0 : index
    %c0_1 = arith.constant 0 : index
    %3 = vector.load %arg3[%c0, %c0_1] : memref<128x512xf32, #tpu.memory_space<vmem>>, vector<128x512xf32>
    %4 = tpu.iota {dimensions = array<i32: 1>} : vector<8x512xi32>
    %c256_i32 = arith.constant 256 : i32
    %5 = vector.broadcast %c256_i32 : i32 to vector<8x512xi32>
    %6 = arith.cmpi sge, %4, %5 : vector<8x512xi32>
    %c384_i32 = arith.constant 384 : i32
    %7 = vector.broadcast %c384_i32 : i32 to vector<8x512xi32>
    %8 = arith.cmpi slt, %4, %7 : vector<8x512xi32>
    %9 = arith.andi %6, %8 : vector<8x512xi1>
    %cst = arith.constant 1.000000e+00 : f32
    %cst_2 = arith.constant 5.000000e-01 : f32
    %10 = vector.broadcast %cst : f32 to vector<8x512xf32>
    %11 = vector.broadcast %cst_2 : f32 to vector<8x512xf32>
    %12 = arith.select %9, %10, %11 : vector<8x512xi1>, vector<8x512xf32>
    %cst_3 = arith.constant 0.000000e+00 : f32
    %cst_4 = arith.constant 5.000000e-01 : f32
    %13 = vector.broadcast %cst_3 : f32 to vector<8x512xf32>
    %14 = vector.broadcast %cst_4 : f32 to vector<8x512xf32>
    %15 = arith.select %9, %13, %14 : vector<8x512xi1>, vector<8x512xf32>
    %c0_5 = arith.constant 0 : index
    %c0_6 = arith.constant 0 : index
    %16 = vector.load %arg7[%c0_5, %c0_6] : memref<8x128xf32, #tpu.memory_space<vmem>>, vector<8x128xf32>
    %c0_7 = arith.constant 0 : index
    %c0_8 = arith.constant 0 : index
    %17 = vector.load %arg8[%c0_7, %c0_8] : memref<8x128xf32, #tpu.memory_space<vmem>>, vector<8x128xf32>
    %c0_i32_9 = arith.constant 0 : i32
    %18 = arith.index_cast %c0_i32_9 : i32 to index
    %c0_10 = arith.constant 0 : index
    %c0_11 = arith.constant 0 : index
    %19 = vector.load %arg2[%18, %c0_10, %c0_11] : memref<8x8x512xbf16, #tpu.memory_space<vmem>>, vector<1x8x512xbf16>
    %20 = vector.shape_cast %19 : vector<1x8x512xbf16> to vector<8x512xbf16>
    %21 = arith.extf %20 : vector<8x512xbf16> to vector<8x512xf32>
    %cst_12 = arith.constant dense<0.000000e+00> : vector<8x512xf32>
    %22 = tpu.matmul %16, %3, %cst_12 {dimension_numbers = #tpu.dot_dimension_numbers<[1], [0], [0], [1], [0, 0, 1, 1], [], []>} : vector<8x128xf32>, vector<128x512xf32>, vector<8x512xf32> -> vector<8x512xf32>
    %23 = arith.addf %21, %22 : vector<8x512xf32>
    %24 = arith.mulf %23, %12 : vector<8x512xf32>
    %25 = math.tanh %24 : vector<8x512xf32>
    %26 = arith.mulf %12, %25 : vector<8x512xf32>
    %27 = arith.addf %26, %15 : vector<8x512xf32>
    %28 = vector.extract_strided_slice %27 {offsets = [0, 0], sizes = [8, 128], strides = [1, 1]} : vector<8x512xf32> to vector<8x128xf32>
    %29 = vector.extract_strided_slice %27 {offsets = [0, 128], sizes = [8, 128], strides = [1, 1]} : vector<8x512xf32> to vector<8x128xf32>
    %30 = vector.extract_strided_slice %27 {offsets = [0, 256], sizes = [8, 128], strides = [1, 1]} : vector<8x512xf32> to vector<8x128xf32>
    %31 = vector.extract_strided_slice %27 {offsets = [0, 384], sizes = [8, 128], strides = [1, 1]} : vector<8x512xf32> to vector<8x128xf32>
    %32 = arith.mulf %29, %17 : vector<8x128xf32>
    %33 = arith.mulf %28, %30 : vector<8x128xf32>
    %34 = arith.addf %32, %33 : vector<8x128xf32>
    %35 = math.tanh %34 : vector<8x128xf32>
    %36 = arith.mulf %31, %35 : vector<8x128xf32>
    %c1_i32 = arith.constant 1 : i32
    %37 = arith.index_cast %c1_i32 : i32 to index
    %c0_13 = arith.constant 0 : index
    %c0_14 = arith.constant 0 : index
    %38 = vector.load %arg2[%37, %c0_13, %c0_14] : memref<8x8x512xbf16, #tpu.memory_space<vmem>>, vector<1x8x512xbf16>
    %39 = vector.shape_cast %38 : vector<1x8x512xbf16> to vector<8x512xbf16>
    %40 = arith.extf %39 : vector<8x512xbf16> to vector<8x512xf32>
    %cst_15 = arith.constant dense<0.000000e+00> : vector<8x512xf32>
    %41 = tpu.matmul %36, %3, %cst_15 {dimension_numbers = #tpu.dot_dimension_numbers<[1], [0], [0], [1], [0, 0, 1, 1], [], []>} : vector<8x128xf32>, vector<128x512xf32>, vector<8x512xf32> -> vector<8x512xf32>
    %42 = arith.addf %40, %41 : vector<8x512xf32>
    %43 = arith.mulf %42, %12 : vector<8x512xf32>
    %44 = math.tanh %43 : vector<8x512xf32>
    %45 = arith.mulf %12, %44 : vector<8x512xf32>
    %46 = arith.addf %45, %15 : vector<8x512xf32>
    %47 = vector.extract_strided_slice %46 {offsets = [0, 0], sizes = [8, 128], strides = [1, 1]} : vector<8x512xf32> to vector<8x128xf32>
    %48 = vector.extract_strided_slice %46 {offsets = [0, 128], sizes = [8, 128], strides = [1, 1]} : vector<8x512xf32> to vector<8x128xf32>
    %49 = vector.extract_strided_slice %46 {offsets = [0, 256], sizes = [8, 128], strides = [1, 1]} : vector<8x512xf32> to vector<8x128xf32>
    %50 = vector.extract_strided_slice %46 {offsets = [0, 384], sizes = [8, 128], strides = [1, 1]} : vector<8x512xf32> to vector<8x128xf32>
    %51 = arith.mulf %48, %34 : vector<8x128xf32>
    %52 = arith.mulf %47, %49 : vector<8x128xf32>
    %53 = arith.addf %51, %52 : vector<8x128xf32>
    %54 = math.tanh %53 : vector<8x128xf32>
    %55 = arith.mulf %50, %54 : vector<8x128xf32>
    %c2_i32 = arith.constant 2 : i32
    %56 = arith.index_cast %c2_i32 : i32 to index
    %c0_16 = arith.constant 0 : index
    %c0_17 = arith.constant 0 : index
    %57 = vector.load %arg2[%56, %c0_16, %c0_17] : memref<8x8x512xbf16, #tpu.memory_space<vmem>>, vector<1x8x512xbf16>
    %58 = vector.shape_cast %57 : vector<1x8x512xbf16> to vector<8x512xbf16>
    %59 = arith.extf %58 : vector<8x512xbf16> to vector<8x512xf32>
    %cst_18 = arith.constant dense<0.000000e+00> : vector<8x512xf32>
    %60 = tpu.matmul %55, %3, %cst_18 {dimension_numbers = #tpu.dot_dimension_numbers<[1], [0], [0], [1], [0, 0, 1, 1], [], []>} : vector<8x128xf32>, vector<128x512xf32>, vector<8x512xf32> -> vector<8x512xf32>
    %61 = arith.addf %59, %60 : vector<8x512xf32>
    %62 = arith.mulf %61, %12 : vector<8x512xf32>
    %63 = math.tanh %62 : vector<8x512xf32>
    %64 = arith.mulf %12, %63 : vector<8x512xf32>
    %65 = arith.addf %64, %15 : vector<8x512xf32>
    %66 = vector.extract_strided_slice %65 {offsets = [0, 0], sizes = [8, 128], strides = [1, 1]} : vector<8x512xf32> to vector<8x128xf32>
    %67 = vector.extract_strided_slice %65 {offsets = [0, 128], sizes = [8, 128], strides = [1, 1]} : vector<8x512xf32> to vector<8x128xf32>
    %68 = vector.extract_strided_slice %65 {offsets = [0, 256], sizes = [8, 128], strides = [1, 1]} : vector<8x512xf32> to vector<8x128xf32>
    %69 = vector.extract_strided_slice %65 {offsets = [0, 384], sizes = [8, 128], strides = [1, 1]} : vector<8x512xf32> to vector<8x128xf32>
    %70 = arith.mulf %67, %53 : vector<8x128xf32>
    %71 = arith.mulf %66, %68 : vector<8x128xf32>
    %72 = arith.addf %70, %71 : vector<8x128xf32>
    %73 = math.tanh %72 : vector<8x128xf32>
    %74 = arith.mulf %69, %73 : vector<8x128xf32>
    %c3_i32 = arith.constant 3 : i32
    %75 = arith.index_cast %c3_i32 : i32 to index
    %c0_19 = arith.constant 0 : index
    %c0_20 = arith.constant 0 : index
    %76 = vector.load %arg2[%75, %c0_19, %c0_20] : memref<8x8x512xbf16, #tpu.memory_space<vmem>>, vector<1x8x512xbf16>
    %77 = vector.shape_cast %76 : vector<1x8x512xbf16> to vector<8x512xbf16>
    %78 = arith.extf %77 : vector<8x512xbf16> to vector<8x512xf32>
    %cst_21 = arith.constant dense<0.000000e+00> : vector<8x512xf32>
    %79 = tpu.matmul %74, %3, %cst_21 {dimension_numbers = #tpu.dot_dimension_numbers<[1], [0], [0], [1], [0, 0, 1, 1], [], []>} : vector<8x128xf32>, vector<128x512xf32>, vector<8x512xf32> -> vector<8x512xf32>
    %80 = arith.addf %78, %79 : vector<8x512xf32>
    %81 = arith.mulf %80, %12 : vector<8x512xf32>
    %82 = math.tanh %81 : vector<8x512xf32>
    %83 = arith.mulf %12, %82 : vector<8x512xf32>
    %84 = arith.addf %83, %15 : vector<8x512xf32>
    %85 = vector.extract_strided_slice %84 {offsets = [0, 0], sizes = [8, 128], strides = [1, 1]} : vector<8x512xf32> to vector<8x128xf32>
    %86 = vector.extract_strided_slice %84 {offsets = [0, 128], sizes = [8, 128], strides = [1, 1]} : vector<8x512xf32> to vector<8x128xf32>
    %87 = vector.extract_strided_slice %84 {offsets = [0, 256], sizes = [8, 128], strides = [1, 1]} : vector<8x512xf32> to vector<8x128xf32>
    %88 = vector.extract_strided_slice %84 {offsets = [0, 384], sizes = [8, 128], strides = [1, 1]} : vector<8x512xf32> to vector<8x128xf32>
    %89 = arith.mulf %86, %72 : vector<8x128xf32>
    %90 = arith.mulf %85, %87 : vector<8x128xf32>
    %91 = arith.addf %89, %90 : vector<8x128xf32>
    %92 = math.tanh %91 : vector<8x128xf32>
    %93 = arith.mulf %88, %92 : vector<8x128xf32>
    %c4_i32 = arith.constant 4 : i32
    %94 = arith.index_cast %c4_i32 : i32 to index
    %c0_22 = arith.constant 0 : index
    %c0_23 = arith.constant 0 : index
    %95 = vector.load %arg2[%94, %c0_22, %c0_23] : memref<8x8x512xbf16, #tpu.memory_space<vmem>>, vector<1x8x512xbf16>
    %96 = vector.shape_cast %95 : vector<1x8x512xbf16> to vector<8x512xbf16>
    %97 = arith.extf %96 : vector<8x512xbf16> to vector<8x512xf32>
    %cst_24 = arith.constant dense<0.000000e+00> : vector<8x512xf32>
    %98 = tpu.matmul %93, %3, %cst_24 {dimension_numbers = #tpu.dot_dimension_numbers<[1], [0], [0], [1], [0, 0, 1, 1], [], []>} : vector<8x128xf32>, vector<128x512xf32>, vector<8x512xf32> -> vector<8x512xf32>
    %99 = arith.addf %97, %98 : vector<8x512xf32>
    %100 = arith.mulf %99, %12 : vector<8x512xf32>
    %101 = math.tanh %100 : vector<8x512xf32>
    %102 = arith.mulf %12, %101 : vector<8x512xf32>
    %103 = arith.addf %102, %15 : vector<8x512xf32>
    %104 = vector.extract_strided_slice %103 {offsets = [0, 0], sizes = [8, 128], strides = [1, 1]} : vector<8x512xf32> to vector<8x128xf32>
    %105 = vector.extract_strided_slice %103 {offsets = [0, 128], sizes = [8, 128], strides = [1, 1]} : vector<8x512xf32> to vector<8x128xf32>
    %106 = vector.extract_strided_slice %103 {offsets = [0, 256], sizes = [8, 128], strides = [1, 1]} : vector<8x512xf32> to vector<8x128xf32>
    %107 = vector.extract_strided_slice %103 {offsets = [0, 384], sizes = [8, 128], strides = [1, 1]} : vector<8x512xf32> to vector<8x128xf32>
    %108 = arith.mulf %105, %91 : vector<8x128xf32>
    %109 = arith.mulf %104, %106 : vector<8x128xf32>
    %110 = arith.addf %108, %109 : vector<8x128xf32>
    %111 = math.tanh %110 : vector<8x128xf32>
    %112 = arith.mulf %107, %111 : vector<8x128xf32>
    %c5_i32 = arith.constant 5 : i32
    %113 = arith.index_cast %c5_i32 : i32 to index
    %c0_25 = arith.constant 0 : index
    %c0_26 = arith.constant 0 : index
    %114 = vector.load %arg2[%113, %c0_25, %c0_26] : memref<8x8x512xbf16, #tpu.memory_space<vmem>>, vector<1x8x512xbf16>
    %115 = vector.shape_cast %114 : vector<1x8x512xbf16> to vector<8x512xbf16>
    %116 = arith.extf %115 : vector<8x512xbf16> to vector<8x512xf32>
    %cst_27 = arith.constant dense<0.000000e+00> : vector<8x512xf32>
    %117 = tpu.matmul %112, %3, %cst_27 {dimension_numbers = #tpu.dot_dimension_numbers<[1], [0], [0], [1], [0, 0, 1, 1], [], []>} : vector<8x128xf32>, vector<128x512xf32>, vector<8x512xf32> -> vector<8x512xf32>
    %118 = arith.addf %116, %117 : vector<8x512xf32>
    %119 = arith.mulf %118, %12 : vector<8x512xf32>
    %120 = math.tanh %119 : vector<8x512xf32>
    %121 = arith.mulf %12, %120 : vector<8x512xf32>
    %122 = arith.addf %121, %15 : vector<8x512xf32>
    %123 = vector.extract_strided_slice %122 {offsets = [0, 0], sizes = [8, 128], strides = [1, 1]} : vector<8x512xf32> to vector<8x128xf32>
    %124 = vector.extract_strided_slice %122 {offsets = [0, 128], sizes = [8, 128], strides = [1, 1]} : vector<8x512xf32> to vector<8x128xf32>
    %125 = vector.extract_strided_slice %122 {offsets = [0, 256], sizes = [8, 128], strides = [1, 1]} : vector<8x512xf32> to vector<8x128xf32>
    %126 = vector.extract_strided_slice %122 {offsets = [0, 384], sizes = [8, 128], strides = [1, 1]} : vector<8x512xf32> to vector<8x128xf32>
    %127 = arith.mulf %124, %110 : vector<8x128xf32>
    %128 = arith.mulf %123, %125 : vector<8x128xf32>
    %129 = arith.addf %127, %128 : vector<8x128xf32>
    %130 = math.tanh %129 : vector<8x128xf32>
    %131 = arith.mulf %126, %130 : vector<8x128xf32>
    %c6_i32 = arith.constant 6 : i32
    %132 = arith.index_cast %c6_i32 : i32 to index
    %c0_28 = arith.constant 0 : index
    %c0_29 = arith.constant 0 : index
    %133 = vector.load %arg2[%132, %c0_28, %c0_29] : memref<8x8x512xbf16, #tpu.memory_space<vmem>>, vector<1x8x512xbf16>
    %134 = vector.shape_cast %133 : vector<1x8x512xbf16> to vector<8x512xbf16>
    %135 = arith.extf %134 : vector<8x512xbf16> to vector<8x512xf32>
    %cst_30 = arith.constant dense<0.000000e+00> : vector<8x512xf32>
    %136 = tpu.matmul %131, %3, %cst_30 {dimension_numbers = #tpu.dot_dimension_numbers<[1], [0], [0], [1], [0, 0, 1, 1], [], []>} : vector<8x128xf32>, vector<128x512xf32>, vector<8x512xf32> -> vector<8x512xf32>
    %137 = arith.addf %135, %136 : vector<8x512xf32>
    %138 = arith.mulf %137, %12 : vector<8x512xf32>
    %139 = math.tanh %138 : vector<8x512xf32>
    %140 = arith.mulf %12, %139 : vector<8x512xf32>
    %141 = arith.addf %140, %15 : vector<8x512xf32>
    %142 = vector.extract_strided_slice %141 {offsets = [0, 0], sizes = [8, 128], strides = [1, 1]} : vector<8x512xf32> to vector<8x128xf32>
    %143 = vector.extract_strided_slice %141 {offsets = [0, 128], sizes = [8, 128], strides = [1, 1]} : vector<8x512xf32> to vector<8x128xf32>
    %144 = vector.extract_strided_slice %141 {offsets = [0, 256], sizes = [8, 128], strides = [1, 1]} : vector<8x512xf32> to vector<8x128xf32>
    %145 = vector.extract_strided_slice %141 {offsets = [0, 384], sizes = [8, 128], strides = [1, 1]} : vector<8x512xf32> to vector<8x128xf32>
    %146 = arith.mulf %143, %129 : vector<8x128xf32>
    %147 = arith.mulf %142, %144 : vector<8x128xf32>
    %148 = arith.addf %146, %147 : vector<8x128xf32>
    %149 = math.tanh %148 : vector<8x128xf32>
    %150 = arith.mulf %145, %149 : vector<8x128xf32>
    %c7_i32 = arith.constant 7 : i32
    %151 = arith.index_cast %c7_i32 : i32 to index
    %c0_31 = arith.constant 0 : index
    %c0_32 = arith.constant 0 : index
    %152 = vector.load %arg2[%151, %c0_31, %c0_32] : memref<8x8x512xbf16, #tpu.memory_space<vmem>>, vector<1x8x512xbf16>
    %153 = vector.shape_cast %152 : vector<1x8x512xbf16> to vector<8x512xbf16>
    %154 = arith.extf %153 : vector<8x512xbf16> to vector<8x512xf32>
    %cst_33 = arith.constant dense<0.000000e+00> : vector<8x512xf32>
    %155 = tpu.matmul %150, %3, %cst_33 {dimension_numbers = #tpu.dot_dimension_numbers<[1], [0], [0], [1], [0, 0, 1, 1], [], []>} : vector<8x128xf32>, vector<128x512xf32>, vector<8x512xf32> -> vector<8x512xf32>
    %156 = arith.addf %154, %155 : vector<8x512xf32>
    %157 = arith.mulf %156, %12 : vector<8x512xf32>
    %158 = math.tanh %157 : vector<8x512xf32>
    %159 = arith.mulf %12, %158 : vector<8x512xf32>
    %160 = arith.addf %159, %15 : vector<8x512xf32>
    %161 = vector.extract_strided_slice %160 {offsets = [0, 0], sizes = [8, 128], strides = [1, 1]} : vector<8x512xf32> to vector<8x128xf32>
    %162 = vector.extract_strided_slice %160 {offsets = [0, 128], sizes = [8, 128], strides = [1, 1]} : vector<8x512xf32> to vector<8x128xf32>
    %163 = vector.extract_strided_slice %160 {offsets = [0, 256], sizes = [8, 128], strides = [1, 1]} : vector<8x512xf32> to vector<8x128xf32>
    %164 = vector.extract_strided_slice %160 {offsets = [0, 384], sizes = [8, 128], strides = [1, 1]} : vector<8x512xf32> to vector<8x128xf32>
    %165 = arith.mulf %162, %148 : vector<8x128xf32>
    %166 = arith.mulf %161, %163 : vector<8x128xf32>
    %167 = arith.addf %165, %166 : vector<8x128xf32>
    %168 = math.tanh %167 : vector<8x128xf32>
    %169 = arith.mulf %164, %168 : vector<8x128xf32>
    %c8_i32 = arith.constant 8 : i32
    %c0_34 = arith.constant 0 : index
    %c0_35 = arith.constant 0 : index
    %170 = vector.load %arg7[%c0_34, %c0_35] : memref<8x128xf32, #tpu.memory_space<vmem>>, vector<8x128xf32>
    tpu.vector_store %arg7[%c0_34, %c0_35], %169 {strides = array<i32>} : memref<8x128xf32, #tpu.memory_space<vmem>>, vector<8x128xf32>,
    %c0_36 = arith.constant 0 : index
    %c0_37 = arith.constant 0 : index
    %171 = vector.load %arg8[%c0_36, %c0_37] : memref<8x128xf32, #tpu.memory_space<vmem>>, vector<8x128xf32>
    tpu.vector_store %arg8[%c0_36, %c0_37], %167 {strides = array<i32>} : memref<8x128xf32, #tpu.memory_space<vmem>>, vector<8x128xf32>,
    %c0_i32_38 = arith.constant 0 : i32
    %172 = arith.cmpi eq, %arg1, %c0_i32_38 : i32
    %173 = arith.extui %172 : i1 to i32
    %c0_i32_39 = arith.constant 0 : i32
    %174 = arith.cmpi ne, %173, %c0_i32_39 : i32
    scf.if %174 {
      %c0_40 = arith.constant 0 : index
      %c0_41 = arith.constant 0 : index
      %175 = vector.load %arg7[%c0_40, %c0_41] : memref<8x128xf32, #tpu.memory_space<vmem>>, vector<8x128xf32>
      %c0_42 = arith.constant 0 : index
      %c0_43 = arith.constant 0 : index
      %176 = vector.load %arg4[%c0_42, %c0_43] : memref<128x128xf32, #tpu.memory_space<vmem>>, vector<128x128xf32>
      %cst_44 = arith.constant dense<0.000000e+00> : vector<8x128xf32>
      %177 = tpu.matmul %175, %176, %cst_44 {dimension_numbers = #tpu.dot_dimension_numbers<[1], [0], [0], [1], [0, 0, 1, 1], [], []>} : vector<8x128xf32>, vector<128x128xf32>, vector<8x128xf32> -> vector<8x128xf32>
      %c0_45 = arith.constant 0 : index
      %c0_46 = arith.constant 0 : index
      %178 = vector.load %arg5[%c0_45, %c0_46] : memref<1x128xf32, #tpu.memory_space<vmem>>, vector<1x128xf32>
      %179 = vector.broadcast %178 : vector<1x128xf32> to vector<8x128xf32>
      %180 = arith.addf %177, %179 : vector<8x128xf32>
      %181 = tpu.iota {dimensions = array<i32: 1>} : vector<8x128xi32>
      %c5_i32_47 = arith.constant 5 : i32
      %182 = vector.broadcast %c5_i32_47 : i32 to vector<8x128xi32>
      %183 = arith.cmpi slt, %181, %182 : vector<8x128xi32>
      %cst_48 = arith.constant -1.000000e+30 : f32
      %184 = vector.broadcast %cst_48 : f32 to vector<8x128xf32>
      %185 = arith.select %183, %180, %184 : vector<8x128xi1>, vector<8x128xf32>
      %cst_49 = arith.constant dense<0xFF800000> : vector<8xf32>
      %186 = vector.multi_reduction <maximumf>, %185, %cst_49 [1] : vector<8x128xf32> to vector<8xf32>
      %187 = vector.shape_cast %186 : vector<8xf32> to vector<8x1xf32>
      %188 = vector.broadcast %187 : vector<8x1xf32> to vector<8x128xf32>
      %189 = arith.subf %185, %188 : vector<8x128xf32>
      %190 = math.exp %189 : vector<8x128xf32>
      %cst_50 = arith.constant dense<0.000000e+00> : vector<8xf32>
      %191 = vector.multi_reduction <add>, %190, %cst_50 [1] : vector<8x128xf32> to vector<8xf32>
      %192 = vector.shape_cast %191 : vector<8xf32> to vector<8x1xf32>
      %193 = vector.broadcast %192 : vector<8x1xf32> to vector<8x128xf32>
      %194 = arith.divf %190, %193 : vector<8x128xf32>
      %c0_51 = arith.constant 0 : index
      %c0_52 = arith.constant 0 : index
      %195 = vector.load %arg6[%c0_51, %c0_52] : memref<8x128xf32, #tpu.memory_space<vmem>>, vector<8x128xf32>
      tpu.vector_store %arg6[%c0_51, %c0_52], %194 {strides = array<i32>} : memref<8x128xf32, #tpu.memory_space<vmem>>, vector<8x128xf32>,
    } else {
    }
    return
  }
  func.func @transform_0(%arg0: i32, %arg1: i32) -> (i32, i32, i32) {
    %c0_i32 = arith.constant 0 : i32
    %c0_i32_0 = arith.constant 0 : i32
    return %arg1, %arg0, %c0_i32 : i32, i32, i32
  }
  func.func @transform_1(%arg0: i32, %arg1: i32) -> (i32, i32) {
    %c0_i32 = arith.constant 0 : i32
    %c0_i32_0 = arith.constant 0 : i32
    %c0_i32_1 = arith.constant 0 : i32
    return %c0_i32, %c0_i32_0 : i32, i32
  }
  func.func @transform_2(%arg0: i32, %arg1: i32) -> (i32, i32) {
    %c0_i32 = arith.constant 0 : i32
    %c0_i32_0 = arith.constant 0 : i32
    %c0_i32_1 = arith.constant 0 : i32
    return %c0_i32, %c0_i32_0 : i32, i32
  }
  func.func @transform_3(%arg0: i32, %arg1: i32) -> (i32, i32) {
    %c0_i32 = arith.constant 0 : i32
    %c0_i32_0 = arith.constant 0 : i32
    %c0_i32_1 = arith.constant 0 : i32
    return %c0_i32, %c0_i32_0 : i32, i32
  }
  func.func @transform_4(%arg0: i32, %arg1: i32) -> (i32, i32) {
    %c0_i32 = arith.constant 0 : i32
    %c0_i32_0 = arith.constant 0 : i32
    return %arg0, %c0_i32 : i32, i32
  }
}

</mosaic_0001>

<bundles_post_ra>
// kernel: tpu_custom_call.1
= control target key start
LH: loop header
LB: loop body
LE: loop exit
PB: predicated region body
PF: predicated region fallthrough
CT: control target
= control target key end

     0   :  { %9 = vsyncpa [#allocation5], 0  ;;  %s2251_s0 = inlined_call_operand.hbm [shape: bf16[8,8,512], index: 0, kind: input, shape index: {}]   ;;  %s2252_s1 = inlined_call_operand.hbm [shape: f32[128,512], index: 1, kind: input, shape index: {}]   ;;  %s2253_s2 = inlined_call_operand.hbm [shape: f32[128,128], index: 2, kind: input, shape index: {}]   ;;  %s2254_s3 = inlined_call_operand.vmem [shape: f32[1,128], index: 3, kind: input, shape index: {}]   ;;  %s2255_s4 = inlined_call_operand.hbm [shape: f32[8,128], index: 4, kind: output, shape index: {}]  }
   0x1   :  { %10 = vsyncpa [#allocation8], 0  ;;  %s29_s17 = sshll.u32 %s2252_s1, 4  ;;  %s30_s17 = int_to_ptr.hbm [resolvable:$true] %s29_s17 }
   0x2   :  { %11 = vsyncpa [#allocation6], 0  ;;  %s1408_s18 = smov [#allocation7]   ;;  %s16_s22 = sshll.u32 %s2251_s0, 4  ;;  %s17_s22 = int_to_ptr.hbm [resolvable:$true] %s16_s22 }
   0x3   :  { %s31_s19 = sshll.u32 %s1408_s18, 4  ;;  %s1409_s23 = smov 512   ;;  %s32_s19 = int_to_ptr.vmem [resolvable:$true] %s31_s19 }
   0x4   :  { %s1410_s24 = smov 32   ;;  %s1411_s25 = smov [#allocation4]  }
   0x5   :  { %37 = dma.hbm_to_vmem [thread:$0]  %s30_s17, 8192, %s32_s19, [#allocation8], %s1409_s23, %s1409_s23, %s1410_s24  }
   0x6   :  { %s18_s26 = sshll.u32 %s1411_s25, 4  ;;  %s1412_s27 = smov 256   ;;  %s19_s26 = int_to_ptr.vmem [resolvable:$true] %s18_s26 }
   0x7   :  { %s1413_s28 = smov 16   ;;  %s42_s30 = sshll.u32 %s2253_s2, 4  ;;  %s43_s30 = int_to_ptr.hbm [resolvable:$true] %s42_s30 }
   0x8   :  { %24 = dma.hbm_to_vmem [thread:$0]  %s17_s22, 2048, %s19_s26, [#allocation5], %s1412_s27, %s1412_s27, %s1413_s28  }
   0x9   :  { %s1414_s5 = smov [#allocation9]   ;;  %s1415_s7 = smov 128  }
   0xa   :  { %s44_s6 = sshll.u32 %s1414_s5, 4  ;;  %s1416_s0 = smov 8   ;;  %s45_s6 = int_to_ptr.vmem [resolvable:$true] %s44_s6 }
   0xb   :  { %50 = dma.hbm_to_vmem [thread:$0]  %s43_s30, 2048, %s45_s6, [#allocation8], %s1415_s7, %s1415_s7, %s1416_s0  }
   0xc   :  { %1402 = dma.done.wait [#allocation5], 2048  }
   0xd   :  { %1403 = vsyncadd [#allocation5], 4294965248 }
   0xe   :  { %1404 = dma.done.wait [#allocation8], 10240  }
   0xf   :  { %1405 = vsyncadd [#allocation8], 4294957056  ;;  %v1453_v0 = vld [vmem:[#allocation7 + $0x1e0] sm:$0xff]  ;;  %v1455_v1 = vld [vmem:[#allocation7 + $0x1e8] sm:$0xff]  ;;  %v1417_v63 = vmov 0.0   ;;  %s1135_s12 = sshll.u32 %s2255_s4, 4  ;;  %s1136_s12 = int_to_ptr.hbm [resolvable:$true] %s1135_s12 }
  0x10   :  { %v1457_v2 = vld [vmem:[#allocation7 + $0x1f0] sm:$0xff]  ;;  %168 = vmatpush.msra.mxu0 %v1453_v0  ;;  %188 = vmatpush.msra.mxu1 %v1455_v1  ;;  %v1461_v3 = vld [vmem:[#allocation7 + $0x1c0] sm:$0xff]  ;;  %v1463_v4 = vld [vmem:[#allocation7 + $0x1c8] sm:$0xff] }
  0x11   :  { %v1465_v5 = vld [vmem:[#allocation7 + $0x1d0] sm:$0xff]  ;;  %208 = vmatpush.msra.mxu2 %v1457_v2  ;;  %v1468_v6 = vld [vmem:[#allocation7 + $0x1a0] sm:$0xff]  ;;  %v1470_v7 = vld [vmem:[#allocation7 + $0x1a8] sm:$0xff] }
  0x12   :  { %169 = vmatpush.msra.mxu0 %v1461_v3  ;;  %189 = vmatpush.msra.mxu1 %v1463_v4  ;;  %v1474_v8 = vld [vmem:[#allocation7 + $0x1b0] sm:$0xff]  ;;  %v1476_v9 = vld [vmem:[#allocation7 + $0x1f8] sm:$0xff]  ;;  %v1480_v10 = vld [vmem:[#allocation7 + $0x180] sm:$0xff] }
  0x13   :  { %209 = vmatpush.msra.mxu2 %v1465_v5  ;;  %228 = vmatpush.msra.mxu3 %v1476_v9  ;;  %v1482_v11 = vld [vmem:[#allocation7 + $0x188] sm:$0xff]  ;;  %v1484_v12 = vld [vmem:[#allocation7 + $0x1d8] sm:$0xff]  ;;  %v1488_v13 = vld [vmem:[#allocation7 + $0x190] sm:$0xff] }
  0x14   :  { %170 = vmatpush.msra.mxu0 %v1468_v6  ;;  %190 = vmatpush.msra.mxu1 %v1470_v7  ;;  %v1490_v14 = vld [vmem:[#allocation7 + $0x1b8] sm:$0xff]  ;;  %v1494_v15 = vld [vmem:[#allocation7 + $0x160] sm:$0xff]  ;;  %v1496_v16 = vld [vmem:[#allocation7 + $0x168] sm:$0xff] }
  0x15   :  { %210 = vmatpush.msra.mxu2 %v1474_v8  ;;  %229 = vmatpush.msra.mxu3 %v1484_v12  ;;  %v1500_v17 = vld [vmem:[#allocation7 + $0x170] sm:$0xff]  ;;  %v1502_v18 = vld [vmem:[#allocation7 + $0x198] sm:$0xff]  ;;  %v1506_v19 = vld [vmem:[#allocation7 + $0x140] sm:$0xff] }
  0x16   :  { %171 = vmatpush.msra.mxu0 %v1480_v10  ;;  %191 = vmatpush.msra.mxu1 %v1482_v11  ;;  %v1508_v20 = vld [vmem:[#allocation7 + $0x148] sm:$0xff]  ;;  %v1512_v21 = vld [vmem:[#allocation7 + $0x150] sm:$0xff]  ;;  %v1514_v22 = vld [vmem:[#allocation7 + $0x178] sm:$0xff] }
  0x17   :  { %211 = vmatpush.msra.mxu2 %v1488_v13  ;;  %230 = vmatpush.msra.mxu3 %v1490_v14  ;;  %v1518_v23 = vld [vmem:[#allocation7 + $0x120] sm:$0xff]  ;;  %v1520_v24 = vld [vmem:[#allocation7 + $0x128] sm:$0xff]  ;;  %v1524_v25 = vld [vmem:[#allocation7 + $0x130] sm:$0xff] }
  0x18   :  { %172 = vmatpush.msra.mxu0 %v1494_v15  ;;  %192 = vmatpush.msra.mxu1 %v1496_v16  ;;  %v1526_v26 = vld [vmem:[#allocation7 + $0x158] sm:$0xff]  ;;  %v1530_v27 = vld [vmem:[#allocation7 + $0x100] sm:$0xff]  ;;  %v1532_v28 = vld [vmem:[#allocation7 + $0x108] sm:$0xff] }
  0x19   :  { %212 = vmatpush.msra.mxu2 %v1500_v17  ;;  %231 = vmatpush.msra.mxu3 %v1502_v18  ;;  %v1536_v29 = vld [vmem:[#allocation7 + $0x110] sm:$0xff]  ;;  %v1538_v30 = vld [vmem:[#allocation7 + $0x138] sm:$0xff]  ;;  %v1542_v31 = vld [vmem:[#allocation7 + $0xe0] sm:$0xff] }
  0x1a   :  { %173 = vmatpush.msra.mxu0 %v1506_v19  ;;  %193 = vmatpush.msra.mxu1 %v1508_v20  ;;  %v1544_v32 = vld [vmem:[#allocation7 + $0xe8] sm:$0xff]  ;;  %v1548_v33 = vld [vmem:[#allocation7 + $0xf0] sm:$0xff]  ;;  %v1550_v34 = vld [vmem:[#allocation7 + $0x118] sm:$0xff] }
  0x1b   :  { %213 = vmatpush.msra.mxu2 %v1512_v21  ;;  %232 = vmatpush.msra.mxu3 %v1514_v22  ;;  %v1554_v35 = vld [vmem:[#allocation7 + $0xc0] sm:$0xff]  ;;  %v1556_v36 = vld [vmem:[#allocation7 + $0xc8] sm:$0xff]  ;;  %v1560_v37 = vld [vmem:[#allocation7 + $0xd0] sm:$0xff] }
  0x1c   :  { %174 = vmatpush.msra.mxu0 %v1518_v23  ;;  %194 = vmatpush.msra.mxu1 %v1520_v24  ;;  %v1562_v38 = vld [vmem:[#allocation7 + $0xf8] sm:$0xff]  ;;  %v1566_v39 = vld [vmem:[#allocation7 + $0xa0] sm:$0xff]  ;;  %v1568_v40 = vld [vmem:[#allocation7 + $0xa8] sm:$0xff] }
  0x1d   :  { %214 = vmatpush.msra.mxu2 %v1524_v25  ;;  %233 = vmatpush.msra.mxu3 %v1526_v26  ;;  %v1572_v41 = vld [vmem:[#allocation7 + $0xb0] sm:$0xff]  ;;  %v1574_v42 = vld [vmem:[#allocation7 + $0xd8] sm:$0xff]  ;;  %v1578_v43 = vld [vmem:[#allocation7 + $0x80] sm:$0xff] }
  0x1e   :  { %175 = vmatpush.msra.mxu0 %v1530_v27  ;;  %195 = vmatpush.msra.mxu1 %v1532_v28  ;;  %2320 = vst [vmem:[#allocation14_spill] sm:$0xff] %v1578_v43  ;;  %v1580_v44 = vld [vmem:[#allocation7 + $0x88] sm:$0xff]  ;;  %v1584_v45 = vld [vmem:[#allocation7 + $0x90] sm:$0xff]  ;;  %v1586_v46 = vld [vmem:[#allocation7 + $0xb8] sm:$0xff] }
  0x1f   :  { %215 = vmatpush.msra.mxu2 %v1536_v29  ;;  %234 = vmatpush.msra.mxu3 %v1538_v30  ;;  %2321 = vst [vmem:[#allocation15_spill] sm:$0xff] %v1580_v44  ;;  %v1590_v47 = vld [vmem:[#allocation7 + $0x60] sm:$0xff]  ;;  %v1592_v48 = vld [vmem:[#allocation7 + $0x68] sm:$0xff]  ;;  %v1596_v49 = vld [vmem:[#allocation7 + $0x70] sm:$0xff] }
  0x20   :  { %176 = vmatpush.msra.mxu0 %v1542_v31  ;;  %196 = vmatpush.msra.mxu1 %v1544_v32  ;;  %2322 = vst [vmem:[#allocation16_spill] sm:$0xff] %v1584_v45  ;;  %v1598_v50 = vld [vmem:[#allocation7 + $0x98] sm:$0xff]  ;;  %v1602_v51 = vld [vmem:[#allocation7 + $0x40] sm:$0xff]  ;;  %v1604_v52 = vld [vmem:[#allocation7 + $0x48] sm:$0xff] }
  0x21   :  { %216 = vmatpush.msra.mxu2 %v1548_v33  ;;  %235 = vmatpush.msra.mxu3 %v1550_v34  ;;  %2323 = vst [vmem:[#allocation17_spill] sm:$0xff] %v1586_v46  ;;  %v1608_v53 = vld [vmem:[#allocation7 + $0x50] sm:$0xff]  ;;  %v1610_v54 = vld [vmem:[#allocation7 + $0x78] sm:$0xff]  ;;  %v1614_v55 = vld [vmem:[#allocation7 + $0x20] sm:$0xff] }
  0x22   :  { %177 = vmatpush.msra.mxu0 %v1554_v35  ;;  %197 = vmatpush.msra.mxu1 %v1556_v36  ;;  %2324 = vst [vmem:[#allocation18_spill] sm:$0xff] %v1590_v47  ;;  %v1616_v56 = vld [vmem:[#allocation7 + $0x28] sm:$0xff]  ;;  %v1620_v57 = vld [vmem:[#allocation7 + $0x30] sm:$0xff]  ;;  %v1622_v58 = vld [vmem:[#allocation7 + $0x58] sm:$0xff] }
  0x23   :  { %217 = vmatpush.msra.mxu2 %v1560_v37  ;;  %236 = vmatpush.msra.mxu3 %v1562_v38  ;;  %2325 = vst [vmem:[#allocation19_spill] sm:$0xff] %v1592_v48  ;;  %v1626_v59 = vld [vmem:[#allocation7] sm:$0xff]  ;;  %v1628_v60 = vld [vmem:[#allocation7 + $0x8] sm:$0xff]  ;;  %v1632_v61 = vld [vmem:[#allocation7 + $0x10] sm:$0xff] }
  0x24   :  { %178 = vmatpush.msra.mxu0 %v1566_v39  ;;  %198 = vmatpush.msra.mxu1 %v1568_v40  ;;  %2326 = vst [vmem:[#allocation20_spill] sm:$0xff] %v1596_v49  ;;  %v1638_v62 = vld [vmem:[#allocation7 + $0x38] sm:$0xff] }
  0x25   :  { %218 = vmatpush.msra.mxu2 %v1572_v41  ;;  %237 = vmatpush.msra.mxu3 %v1574_v42  ;;  %2327 = vst [vmem:[#allocation21_spill] sm:$0xff] %v1598_v50 }
  0x26   :  { %179 = vmatpush.msra.mxu0 %v1578_v43  ;;  %199 = vmatpush.msra.mxu1 %v1580_v44  ;;  %2328 = vst [vmem:[#allocation22_spill] sm:$0xff] %v1602_v51 }
  0x27   :  { %219 = vmatpush.msra.mxu2 %v1584_v45  ;;  %238 = vmatpush.msra.mxu3 %v1586_v46  ;;  %2329 = vst [vmem:[#allocation23_spill] sm:$0xff] %v1604_v52 }
  0x28   :  { %180 = vmatpush.msra.mxu0 %v1590_v47  ;;  %200 = vmatpush.msra.mxu1 %v1592_v48  ;;  %2330 = vst [vmem:[#allocation24_spill] sm:$0xff] %v1608_v53 }
  0x29   :  { %2331 = vst [vmem:[#allocation25_spill] sm:$0xff] %v1610_v54  ;;  %220 = vmatpush.msra.mxu2 %v1596_v49  ;;  %239 = vmatpush.msra.mxu3 %v1598_v50 }
  0x2a   :  { %2332 = vst [vmem:[#allocation26_spill] sm:$0xff] %v1614_v55  ;;  %181 = vmatpush.msra.mxu0 %v1602_v51  ;;  %201 = vmatpush.msra.mxu1 %v1604_v52 }
  0x2b   :  { %2333 = vst [vmem:[#allocation27_spill] sm:$0xff] %v1616_v56  ;;  %221 = vmatpush.msra.mxu2 %v1608_v53  ;;  %240 = vmatpush.msra.mxu3 %v1610_v54 }
  0x2c   :  { %2334 = vst [vmem:[#allocation28_spill] sm:$0xff] %v1620_v57  ;;  %182 = vmatpush.msra.mxu0 %v1614_v55  ;;  %202 = vmatpush.msra.mxu1 %v1616_v56  ;;  %v1641_v55 = vld [vmem:[#allocation7 + $0x18] sm:$0xff] }
  0x2d   :  { %2335 = vst [vmem:[#allocation29_spill] sm:$0xff] %v1622_v58  ;;  %222 = vmatpush.msra.mxu2 %v1620_v57  ;;  %241 = vmatpush.msra.mxu3 %v1622_v58 }
  0x2e   :  { %2336 = vst [vmem:[#allocation30_spill] sm:$0xff] %v1626_v59  ;;  %183 = vmatpush.msra.mxu0 %v1626_v59  ;;  %203 = vmatpush.msra.mxu1 %v1628_v60 }
  0x2f   :  { %2337 = vst [vmem:[#allocation31_spill] sm:$0xff] %v1628_v60  ;;  %223 = vmatpush.msra.mxu2 %v1632_v61  ;;  %184 = vmatmul.f32.vlgmr.msra.gmra.mxu0 %v1417_v63 }
  0x30   :  { %2338 = vst [vmem:[#allocation32_spill] sm:$0xff] %v1632_v61  ;;  %204 = vmatmul.f32.vlgmr.msra.gmra.mxu1 %v1417_v63  ;;  %224 = vmatmul.f32.vlgmr.msra.gmra.mxu2 %v1417_v63 }
  0x31   :  { %2339 = vst [vmem:[#allocation33_spill] sm:$0xff] %v1638_v62  ;;  %242 = vmatpush.msra.mxu3 %v1638_v62  ;;  %280 = vmatpush.msrb.mxu0 %v1453_v0 }
  0x32   :  { %2340 = vst [vmem:[#allocation34_spill] sm:$0xff] %v1641_v55  ;;  %300 = vmatpush.msrb.mxu1 %v1455_v1  ;;  %320 = vmatpush.msrb.mxu2 %v1457_v2 }
  0x33   :  { %243 = vmatpush.msra.mxu3 %v1641_v55  ;;  %281 = vmatpush.msrb.mxu0 %v1461_v3 }
  0x34   :  { %244 = vmatmul.f32.vlgmr.msra.gmra.mxu3 %v1417_v63  ;;  %301 = vmatpush.msrb.mxu1 %v1463_v4  ;;  %v2341_v63 = vld [vmem:[#allocation26_spill] sm:$0xff] }
  0x35   :  { %340 = vmatpush.msrb.mxu3 %v1476_v9  ;;  %321 = vmatpush.msrb.mxu2 %v1465_v5 }
  0x36   :  { %282 = vmatpush.msrb.mxu0 %v1468_v6  ;;  %302 = vmatpush.msrb.mxu1 %v1470_v7 }
  0x37   :  { %341 = vmatpush.msrb.mxu3 %v1484_v12  ;;  %322 = vmatpush.msrb.mxu2 %v1474_v8 }
  0x38   :  { %283 = vmatpush.msrb.mxu0 %v1480_v10  ;;  %303 = vmatpush.msrb.mxu1 %v1482_v11 }
  0x39   :  { %342 = vmatpush.msrb.mxu3 %v1490_v14  ;;  %323 = vmatpush.msrb.mxu2 %v1488_v13 }
  0x3a   :  { %284 = vmatpush.msrb.mxu0 %v1494_v15  ;;  %304 = vmatpush.msrb.mxu1 %v1496_v16 }
  0x3b   :  { %343 = vmatpush.msrb.mxu3 %v1502_v18  ;;  %324 = vmatpush.msrb.mxu2 %v1500_v17 }
  0x3c   :  { %285 = vmatpush.msrb.mxu0 %v1506_v19  ;;  %305 = vmatpush.msrb.mxu1 %v1508_v20 }
  0x3d   :  { %344 = vmatpush.msrb.mxu3 %v1514_v22  ;;  %325 = vmatpush.msrb.mxu2 %v1512_v21 }
  0x3e   :  { %286 = vmatpush.msrb.mxu0 %v1518_v23  ;;  %306 = vmatpush.msrb.mxu1 %v1520_v24 }
  0x3f   :  { %345 = vmatpush.msrb.mxu3 %v1526_v26  ;;  %326 = vmatpush.msrb.mxu2 %v1524_v25 }
  0x40   :  { %287 = vmatpush.msrb.mxu0 %v1530_v27  ;;  %307 = vmatpush.msrb.mxu1 %v1532_v28 }
  0x41   :  { %346 = vmatpush.msrb.mxu3 %v1538_v30  ;;  %327 = vmatpush.msrb.mxu2 %v1536_v29 }
  0x42   :  { %288 = vmatpush.msrb.mxu0 %v1542_v31  ;;  %308 = vmatpush.msrb.mxu1 %v1544_v32 }
  0x43   :  { %347 = vmatpush.msrb.mxu3 %v1550_v34  ;;  %328 = vmatpush.msrb.mxu2 %v1548_v33 }
  0x44   :  { %289 = vmatpush.msrb.mxu0 %v1554_v35  ;;  %309 = vmatpush.msrb.mxu1 %v1556_v36 }
  0x45   :  { %348 = vmatpush.msrb.mxu3 %v1562_v38  ;;  %329 = vmatpush.msrb.mxu2 %v1560_v37 }
  0x46   :  { %290 = vmatpush.msrb.mxu0 %v1566_v39  ;;  %310 = vmatpush.msrb.mxu1 %v1568_v40 }
  0x47   :  { %349 = vmatpush.msrb.mxu3 %v1574_v42  ;;  %330 = vmatpush.msrb.mxu2 %v1572_v41 }
  0x48   :  { %291 = vmatpush.msrb.mxu0 %v1578_v43  ;;  %311 = vmatpush.msrb.mxu1 %v1580_v44 }
  0x49   :  { %350 = vmatpush.msrb.mxu3 %v1586_v46  ;;  %331 = vmatpush.msrb.mxu2 %v1584_v45 }
  0x4a   :  { %292 = vmatpush.msrb.mxu0 %v1590_v47  ;;  %312 = vmatpush.msrb.mxu1 %v1592_v48 }
  0x4b   :  { %351 = vmatpush.msrb.mxu3 %v1598_v50  ;;  %332 = vmatpush.msrb.mxu2 %v1596_v49 }
  0x4c   :  { %293 = vmatpush.msrb.mxu0 %v1602_v51  ;;  %313 = vmatpush.msrb.mxu1 %v1604_v52 }
  0x4d   :  { %352 = vmatpush.msrb.mxu3 %v1610_v54  ;;  %333 = vmatpush.msrb.mxu2 %v1608_v53 }
  0x4e   :  { %294 = vmatpush.msrb.mxu0 %v2341_v63  ;;  %314 = vmatpush.msrb.mxu1 %v1616_v56 }
  0x4f   :  { %353 = vmatpush.msrb.mxu3 %v1622_v58  ;;  %334 = vmatpush.msrb.mxu2 %v1620_v57 }
  0x50   :  { %295 = vmatpush.msrb.mxu0 %v1626_v59  ;;  %315 = vmatpush.msrb.mxu1 %v1628_v60 }
  0x51   :  { %354 = vmatpush.msrb.mxu3 %v1638_v62  ;;  %335 = vmatpush.msrb.mxu2 %v1632_v61 }
  0x52   :  { %392 = vmatpush.msra.mxu0 %v1453_v0  ;;  %412 = vmatpush.msra.mxu1 %v1455_v1 }
  0x53   :  { %355 = vmatpush.msrb.mxu3 %v1641_v55  ;;  %432 = vmatpush.msra.mxu2 %v1457_v2 }
  0x54   :  { %393 = vmatpush.msra.mxu0 %v1461_v3  ;;  %413 = vmatpush.msra.mxu1 %v1463_v4 }
  0x55   :  { %452 = vmatpush.msra.mxu3 %v1476_v9  ;;  %433 = vmatpush.msra.mxu2 %v1465_v5 }
  0x56   :  { %394 = vmatpush.msra.mxu0 %v1468_v6  ;;  %414 = vmatpush.msra.mxu1 %v1470_v7 }
  0x57   :  { %453 = vmatpush.msra.mxu3 %v1484_v12  ;;  %434 = vmatpush.msra.mxu2 %v1474_v8 }
  0x58   :  { %395 = vmatpush.msra.mxu0 %v1480_v10  ;;  %415 = vmatpush.msra.mxu1 %v1482_v11 }
  0x59   :  { %454 = vmatpush.msra.mxu3 %v1490_v14  ;;  %435 = vmatpush.msra.mxu2 %v1488_v13 }
  0x5a   :  { %396 = vmatpush.msra.mxu0 %v1494_v15  ;;  %416 = vmatpush.msra.mxu1 %v1496_v16 }
  0x5b   :  { %455 = vmatpush.msra.mxu3 %v1502_v18  ;;  %436 = vmatpush.msra.mxu2 %v1500_v17 }
  0x5c   :  { %397 = vmatpush.msra.mxu0 %v1506_v19  ;;  %417 = vmatpush.msra.mxu1 %v1508_v20 }
  0x5d   :  { %456 = vmatpush.msra.mxu3 %v1514_v22  ;;  %437 = vmatpush.msra.mxu2 %v1512_v21 }
  0x5e   :  { %398 = vmatpush.msra.mxu0 %v1518_v23  ;;  %418 = vmatpush.msra.mxu1 %v1520_v24 }
  0x5f   :  { %457 = vmatpush.msra.mxu3 %v1526_v26  ;;  %438 = vmatpush.msra.mxu2 %v1524_v25 }
  0x60   :  { %399 = vmatpush.msra.mxu0 %v1530_v27  ;;  %419 = vmatpush.msra.mxu1 %v1532_v28 }
  0x61   :  { %458 = vmatpush.msra.mxu3 %v1538_v30  ;;  %439 = vmatpush.msra.mxu2 %v1536_v29 }
  0x62   :  { %400 = vmatpush.msra.mxu0 %v1542_v31  ;;  %420 = vmatpush.msra.mxu1 %v1544_v32 }
  0x63   :  { %459 = vmatpush.msra.mxu3 %v1550_v34  ;;  %440 = vmatpush.msra.mxu2 %v1548_v33 }
  0x64   :  { %401 = vmatpush.msra.mxu0 %v1554_v35  ;;  %421 = vmatpush.msra.mxu1 %v1556_v36 }
  0x65   :  { %460 = vmatpush.msra.mxu3 %v1562_v38  ;;  %441 = vmatpush.msra.mxu2 %v1560_v37 }
  0x66   :  { %402 = vmatpush.msra.mxu0 %v1566_v39  ;;  %422 = vmatpush.msra.mxu1 %v1568_v40 }
  0x67   :  { %461 = vmatpush.msra.mxu3 %v1574_v42  ;;  %442 = vmatpush.msra.mxu2 %v1572_v41 }
  0x68   :  { %403 = vmatpush.msra.mxu0 %v1578_v43  ;;  %423 = vmatpush.msra.mxu1 %v1580_v44 }
  0x69   :  { %462 = vmatpush.msra.mxu3 %v1586_v46  ;;  %443 = vmatpush.msra.mxu2 %v1584_v45 }
  0x6a   :  { %404 = vmatpush.msra.mxu0 %v1590_v47  ;;  %424 = vmatpush.msra.mxu1 %v1592_v48 }
  0x6b   :  { %463 = vmatpush.msra.mxu3 %v1598_v50  ;;  %444 = vmatpush.msra.mxu2 %v1596_v49  ;;  %v163_v49 = vld [vmem:[#allocation4 + $0x8] sm:$0xff] }
  0x6c   :  { %405 = vmatpush.msra.mxu0 %v1602_v51  ;;  %425 = vmatpush.msra.mxu1 %v1604_v52  ;;  %v162_v52 = vld [vmem:[#allocation4] sm:$0xff]  ;;  %v166_v47 = vunpack.c.l.bf16 %v163_v49 }
  0x6d   :  { %464 = vmatpush.msra.mxu3 %v1610_v54  ;;  %445 = vmatpush.msra.mxu2 %v1608_v53  ;;  %v164_v53 = vunpack.c.l.bf16 %v162_v52  ;;  %v165_v51 = vunpack.c.h.bf16 %v162_v52 }
  0x6e   :  { %406 = vmatpush.msra.mxu0 %v2341_v63  ;;  %426 = vmatpush.msra.mxu1 %v1616_v56 }
  0x6f   :  { %465 = vmatpush.msra.mxu3 %v1622_v58  ;;  %446 = vmatpush.msra.mxu2 %v1620_v57 }
  0x70   :  { %407 = vmatpush.msra.mxu0 %v1626_v59  ;;  %427 = vmatpush.msra.mxu1 %v1628_v60  ;;  %v167_v60 = vunpack.c.h.bf16 %v163_v49 }
  0x71   :  { %466 = vmatpush.msra.mxu3 %v1638_v62  ;;  %447 = vmatpush.msra.mxu2 %v1632_v61 }
  0x73   :  { %467 = vmatpush.msra.mxu3 %v1641_v55 }
  0xac   :  { %v185_v58 = vpop.f32.mrf.mxu0 }
  0xad   :  { %v248_v54 = vadd.f32 %v185_v58, %v164_v53  ;;  %v205_v63 = vpop.f32.mrf.mxu1 }
  0xae   :  { %v249_v56 = vadd.f32 %v205_v63, %v165_v51  ;;  %v2351_v63 = vld [vmem:[#allocation22_spill] sm:$0xff] }
  0xaf   :  { %v252_v48 = vmul.f32 0.5, %v248_v54 }
  0xb0   :  { %v253_v57 = vmul.f32 0.5, %v249_v56 }
  0xb1   :  { %1158 = vtanh.f32 %v252_v48 }
  0xb2   :  { %1160 = vtanh.f32 %v253_v57 }
  0xb3   :  { %v225_v59 = vpop.f32.mrf.mxu2 }
  0xb4   :  { %v250_v62 = vadd.f32 %v225_v59, %v166_v47 }
  0xb6   :  { %1162 = vtanh.f32 %v250_v62  ;;  %v2350_v62 = vld [vmem:[#allocation25_spill] sm:$0xff] }
  0xb7   :  { %v1159_v61 = vpop.eup %1158  ;;  %v245_v50 = vpop.f32.mrf.mxu3 }
  0xb8   :  { %v1161_v55 = vpop.eup %1160  ;;  %v260_v45 = vmul.f32 0.5, %v1159_v61  ;;  %v251_v44 = vadd.f32 %v245_v50, %v167_v60  ;;  %v2346_v50 = vld [vmem:[#allocation21_spill] sm:$0xff]  ;;  %v2348_v60 = vld [vmem:[#allocation19_spill] sm:$0xff]  ;;  %v2349_v61 = vld [vmem:[#allocation20_spill] sm:$0xff] }
  0xb9   :  { %v261_v52 = vmul.f32 0.5, %v1161_v55  ;;  %v2347_v55 = vld [vmem:[#allocation18_spill] sm:$0xff] }
  0xba   :  { %v264_v43 = vadd.f32 0.5, %v260_v45  ;;  %v255_v53 = vmul.f32 0.5, %v251_v44  ;;  %v2343_v44 = vld [vmem:[#allocation14_spill] sm:$0xff]  ;;  %v2344_v45 = vld [vmem:[#allocation15_spill] sm:$0xff] }
  0xbb   :  { %v265_v58 = vadd.f32 0.5, %v261_v52  ;;  %v2352_v52 = vld [vmem:[#allocation23_spill] sm:$0xff] }
  0xbc   :  { %v1163_v46 = vpop.eup %1162  ;;  %1164 = vtanh.f32 %v255_v53  ;;  %v2353_v53 = vld [vmem:[#allocation24_spill] sm:$0xff] }
  0xbd   :  { %v268_v51 = vmul.f32 0.0, %v265_v58  ;;  %v269_v54 = vmul.f32 %v1163_v46, %v264_v43  ;;  %v2342_v43 = vld [vmem:[#allocation17_spill] sm:$0xff]  ;;  %v2345_v46 = vld [vmem:[#allocation16_spill] sm:$0xff] }
  0xbe   :  { %v2354_v58 = vld [vmem:[#allocation29_spill] sm:$0xff] }
  0xbf   :  { %v1773_v56 = vadd.f32 %v269_v54, %v268_v51  ;;  %v2355_v51 = vld [vmem:[#allocation26_spill] sm:$0xff]  ;;  %v2356_v54 = vld [vmem:[#allocation27_spill] sm:$0xff] }
  0xc1   :  { %1166 = vtanh.f32 %v1773_v56 }
  0xc2   :  { %v1165_v47 = vpop.eup %1164 }
  0xc3   :  { %v263_v48 = vmul.f32 0.5, %v1165_v47  ;;  %v2357_v47 = vld [vmem:[#allocation28_spill] sm:$0xff] }
  0xc5   :  { %v267_v49 = vadd.f32 0.5, %v263_v48  ;;  %v2358_v48 = vld [vmem:[#allocation33_spill] sm:$0xff] }
  0xc7   :  { %v1167_v57 = vpop.eup %1166 }
  0xc8   :  { %v272_v59 = vmul.f32 %v1167_v57, %v267_v49  ;;  %v2359_v49 = vld [vmem:[#allocation30_spill] sm:$0xff]  ;;  %v2360_v57 = vld [vmem:[#allocation31_spill] sm:$0xff] }
  0xca   :  { %296 = vmatmul.f32.vlgmr.msrb.gmra.mxu0 %v272_v59  ;;  %316 = vmatmul.f32.vlgmr.msrb.gmra.mxu1 %v272_v59 }
  0xcb   :  { %336 = vmatmul.f32.vlgmr.msrb.gmra.mxu2 %v272_v59  ;;  %356 = vmatmul.f32.vlgmr.msrb.gmra.mxu3 %v272_v59  ;;  %v2361_v59 = vld [vmem:[#allocation32_spill] sm:$0xff] }
  0xcc   :  { %504 = vmatpush.msrb.mxu0 %v1453_v0  ;;  %524 = vmatpush.msrb.mxu1 %v1455_v1 }
  0xcd   :  { %544 = vmatpush.msrb.mxu2 %v1457_v2  ;;  %564 = vmatpush.msrb.mxu3 %v1476_v9 }
  0xce   :  { %505 = vmatpush.msrb.mxu0 %v1461_v3  ;;  %525 = vmatpush.msrb.mxu1 %v1463_v4 }
  0xcf   :  { %545 = vmatpush.msrb.mxu2 %v1465_v5  ;;  %565 = vmatpush.msrb.mxu3 %v1484_v12 }
  0xd0   :  { %506 = vmatpush.msrb.mxu0 %v1468_v6  ;;  %526 = vmatpush.msrb.mxu1 %v1470_v7 }
  0xd1   :  { %546 = vmatpush.msrb.mxu2 %v1474_v8  ;;  %566 = vmatpush.msrb.mxu3 %v1490_v14 }
  0xd2   :  { %507 = vmatpush.msrb.mxu0 %v1480_v10  ;;  %527 = vmatpush.msrb.mxu1 %v1482_v11 }
  0xd3   :  { %547 = vmatpush.msrb.mxu2 %v1488_v13  ;;  %567 = vmatpush.msrb.mxu3 %v1502_v18 }
  0xd4   :  { %508 = vmatpush.msrb.mxu0 %v1494_v15  ;;  %528 = vmatpush.msrb.mxu1 %v1496_v16 }
  0xd5   :  { %548 = vmatpush.msrb.mxu2 %v1500_v17  ;;  %568 = vmatpush.msrb.mxu3 %v1514_v22 }
  0xd6   :  { %509 = vmatpush.msrb.mxu0 %v1506_v19  ;;  %529 = vmatpush.msrb.mxu1 %v1508_v20 }
  0xd7   :  { %549 = vmatpush.msrb.mxu2 %v1512_v21  ;;  %569 = vmatpush.msrb.mxu3 %v1526_v26 }
  0xd8   :  { %510 = vmatpush.msrb.mxu0 %v1518_v23  ;;  %530 = vmatpush.msrb.mxu1 %v1520_v24 }
  0xd9   :  { %550 = vmatpush.msrb.mxu2 %v1524_v25  ;;  %570 = vmatpush.msrb.mxu3 %v1538_v30 }
  0xda   :  { %511 = vmatpush.msrb.mxu0 %v1530_v27  ;;  %531 = vmatpush.msrb.mxu1 %v1532_v28 }
  0xdb   :  { %551 = vmatpush.msrb.mxu2 %v1536_v29  ;;  %571 = vmatpush.msrb.mxu3 %v1550_v34 }
  0xdc   :  { %512 = vmatpush.msrb.mxu0 %v1542_v31  ;;  %532 = vmatpush.msrb.mxu1 %v1544_v32 }
  0xdd   :  { %552 = vmatpush.msrb.mxu2 %v1548_v33  ;;  %572 = vmatpush.msrb.mxu3 %v1562_v38 }
  0xde   :  { %513 = vmatpush.msrb.mxu0 %v1554_v35  ;;  %533 = vmatpush.msrb.mxu1 %v1556_v36 }
  0xdf   :  { %553 = vmatpush.msrb.mxu2 %v1560_v37  ;;  %573 = vmatpush.msrb.mxu3 %v1574_v42 }
  0xe0   :  { %514 = vmatpush.msrb.mxu0 %v1566_v39  ;;  %534 = vmatpush.msrb.mxu1 %v1568_v40 }
  0xe1   :  { %554 = vmatpush.msrb.mxu2 %v1572_v41  ;;  %574 = vmatpush.msrb.mxu3 %v2342_v43 }
  0xe2   :  { %515 = vmatpush.msrb.mxu0 %v2343_v44  ;;  %535 = vmatpush.msrb.mxu1 %v2344_v45 }
  0xe3   :  { %555 = vmatpush.msrb.mxu2 %v2345_v46  ;;  %575 = vmatpush.msrb.mxu3 %v2346_v50 }
  0xe4   :  { %516 = vmatpush.msrb.mxu0 %v2347_v55  ;;  %536 = vmatpush.msrb.mxu1 %v2348_v60 }
  0xe5   :  { %556 = vmatpush.msrb.mxu2 %v2349_v61  ;;  %576 = vmatpush.msrb.mxu3 %v2350_v62 }
  0xe6   :  { %517 = vmatpush.msrb.mxu0 %v2351_v63  ;;  %537 = vmatpush.msrb.mxu1 %v2352_v52  ;;  %v2362_v63 = vld [vmem:[#allocation34_spill] sm:$0xff]  ;;  %v274_v52 = vld [vmem:[#allocation4 + $0x10] sm:$0xff] }
  0xe7   :  { %557 = vmatpush.msrb.mxu2 %v2353_v53  ;;  %577 = vmatpush.msrb.mxu3 %v2354_v58  ;;  %v276_v53 = vunpack.c.l.bf16 %v274_v52  ;;  %v277_v62 = vunpack.c.h.bf16 %v274_v52 }
  0xe8   :  { %518 = vmatpush.msrb.mxu0 %v2355_v51  ;;  %538 = vmatpush.msrb.mxu1 %v2356_v54  ;;  %v275_v54 = vld [vmem:[#allocation4 + $0x18] sm:$0xff] }
  0xe9   :  { %558 = vmatpush.msrb.mxu2 %v2357_v47  ;;  %578 = vmatpush.msrb.mxu3 %v2358_v48  ;;  %v278_v50 = vunpack.c.l.bf16 %v275_v54  ;;  %v279_v48 = vunpack.c.h.bf16 %v275_v54 }
  0xea   :  { %519 = vmatpush.msrb.mxu0 %v2359_v49  ;;  %539 = vmatpush.msrb.mxu1 %v2360_v57 }
  0xeb   :  { %559 = vmatpush.msrb.mxu2 %v2361_v59  ;;  %579 = vmatpush.msrb.mxu3 %v2362_v63 }
 0x147   :  { %v297_v58 = vpop.f32.mrf.mxu0  ;;  %v317_v61 = vpop.f32.mrf.mxu1 }
 0x148   :  { %v360_v51 = vadd.f32 %v297_v58, %v276_v53  ;;  %v361_v60 = vadd.f32 %v317_v61, %v277_v62 }
 0x14a   :  { %v364_v55 = vmul.f32 0.5, %v360_v51  ;;  %v365_v47 = vmul.f32 0.5, %v361_v60 }
 0x14c   :  { %1168 = vtanh.f32 %v364_v55 }
 0x14d   :  { %1170 = vtanh.f32 %v365_v47 }
 0x14e   :  { %v337_v49 = vpop.f32.mrf.mxu2  ;;  %v357_v57 = vpop.f32.mrf.mxu3 }
 0x14f   :  { %v362_v46 = vadd.f32 %v337_v49, %v278_v50  ;;  %v363_v59 = vadd.f32 %v357_v57, %v279_v48  ;;  %v2376_v48 = vld [vmem:[#allocation26_spill] sm:$0xff]  ;;  %v2377_v49 = vld [vmem:[#allocation27_spill] sm:$0xff]  ;;  %v2378_v57 = vld [vmem:[#allocation28_spill] sm:$0xff] }
 0x151   :  { %1172 = vtanh.f32 %v362_v46  ;;  %v367_v63 = vmul.f32 0.5, %v363_v59  ;;  %v2379_v59 = vld [vmem:[#allocation33_spill] sm:$0xff] }
 0x152   :  { %v1169_v45 = vpop.eup %1168 }
 0x153   :  { %v1171_v44 = vpop.eup %1170  ;;  %v372_v52 = vmul.f32 0.5, %v1169_v45  ;;  %1174 = vtanh.f32 %v367_v63  ;;  %v2374_v45 = vld [vmem:[#allocation24_spill] sm:$0xff]  ;;  %v2375_v63 = vld [vmem:[#allocation29_spill] sm:$0xff] }
 0x154   :  { %v373_v43 = vmul.f32 0.5, %v1171_v44  ;;  %v2373_v44 = vld [vmem:[#allocation23_spill] sm:$0xff] }
 0x155   :  { %v376_v53 = vadd.f32 0.5, %v372_v52  ;;  %v2380_v52 = vld [vmem:[#allocation30_spill] sm:$0xff] }
 0x156   :  { %v377_v61 = vadd.f32 0.5, %v373_v43  ;;  %v2372_v43 = vld [vmem:[#allocation22_spill] sm:$0xff] }
 0x157   :  { %v1173_v62 = vpop.eup %1172 }
 0x158   :  { %v380_v60 = vmul.f32 %v377_v61, %v1773_v56  ;;  %v381_v58 = vmul.f32 %v1173_v62, %v376_v53  ;;  %v2371_v56 = vld [vmem:[#allocation25_spill] sm:$0xff]  ;;  %v2381_v53 = vld [vmem:[#allocation31_spill] sm:$0xff]  ;;  %v2382_v61 = vld [vmem:[#allocation32_spill] sm:$0xff] }
 0x159   :  { %v1175_v51 = vpop.eup %1174  ;;  %v2383_v62 = vld [vmem:[#allocation34_spill] sm:$0xff] }
 0x15a   :  { %v1841_v55 = vadd.f32 %v381_v58, %v380_v60  ;;  %v375_v50 = vmul.f32 0.5, %v1175_v51  ;;  %v386_v60 = vld [vmem:[#allocation4 + $0x20] sm:$0xff] }
 0x15b   :  { %v388_v58 = vunpack.c.l.bf16 %v386_v60  ;;  %v389_v51 = vunpack.c.h.bf16 %v386_v60 }
 0x15c   :  { %1176 = vtanh.f32 %v1841_v55  ;;  %v379_v54 = vadd.f32 0.5, %v375_v50 }
 0x162   :  { %v1177_v46 = vpop.eup %1176 }
 0x163   :  { %v384_v47 = vmul.f32 %v1177_v46, %v379_v54 }
 0x165   :  { %408 = vmatmul.f32.vlgmr.msra.gmra.mxu0 %v384_v47  ;;  %428 = vmatmul.f32.vlgmr.msra.gmra.mxu1 %v384_v47 }
 0x166   :  { %448 = vmatmul.f32.vlgmr.msra.gmra.mxu2 %v384_v47  ;;  %468 = vmatmul.f32.vlgmr.msra.gmra.mxu3 %v384_v47 }
 0x167   :  { %616 = vmatpush.msra.mxu0 %v1453_v0  ;;  %636 = vmatpush.msra.mxu1 %v1455_v1  ;;  %v2363_v0 = vld [vmem:[#allocation17_spill] sm:$0xff]  ;;  %v2364_v1 = vld [vmem:[#allocation14_spill] sm:$0xff] }
 0x168   :  { %656 = vmatpush.msra.mxu2 %v1457_v2  ;;  %676 = vmatpush.msra.mxu3 %v1476_v9  ;;  %v2365_v2 = vld [vmem:[#allocation15_spill] sm:$0xff] }
 0x169   :  { %617 = vmatpush.msra.mxu0 %v1461_v3  ;;  %637 = vmatpush.msra.mxu1 %v1463_v4  ;;  %v2366_v3 = vld [vmem:[#allocation16_spill] sm:$0xff]  ;;  %v2367_v4 = vld [vmem:[#allocation21_spill] sm:$0xff] }
 0x16a   :  { %657 = vmatpush.msra.mxu2 %v1465_v5  ;;  %677 = vmatpush.msra.mxu3 %v1484_v12  ;;  %v2368_v5 = vld [vmem:[#allocation18_spill] sm:$0xff] }
 0x16b   :  { %618 = vmatpush.msra.mxu0 %v1468_v6  ;;  %638 = vmatpush.msra.mxu1 %v1470_v7  ;;  %v2369_v6 = vld [vmem:[#allocation19_spill] sm:$0xff]  ;;  %v2370_v7 = vld [vmem:[#allocation20_spill] sm:$0xff] }
 0x16c   :  { %658 = vmatpush.msra.mxu2 %v1474_v8  ;;  %678 = vmatpush.msra.mxu3 %v1490_v14 }
 0x16d   :  { %619 = vmatpush.msra.mxu0 %v1480_v10  ;;  %639 = vmatpush.msra.mxu1 %v1482_v11 }
 0x16e   :  { %659 = vmatpush.msra.mxu2 %v1488_v13  ;;  %679 = vmatpush.msra.mxu3 %v1502_v18 }
 0x16f   :  { %620 = vmatpush.msra.mxu0 %v1494_v15  ;;  %640 = vmatpush.msra.mxu1 %v1496_v16 }
 0x170   :  { %660 = vmatpush.msra.mxu2 %v1500_v17  ;;  %680 = vmatpush.msra.mxu3 %v1514_v22 }
 0x171   :  { %621 = vmatpush.msra.mxu0 %v1506_v19  ;;  %641 = vmatpush.msra.mxu1 %v1508_v20 }
 0x172   :  { %661 = vmatpush.msra.mxu2 %v1512_v21  ;;  %681 = vmatpush.msra.mxu3 %v1526_v26 }
 0x173   :  { %622 = vmatpush.msra.mxu0 %v1518_v23  ;;  %642 = vmatpush.msra.mxu1 %v1520_v24 }
 0x174   :  { %662 = vmatpush.msra.mxu2 %v1524_v25  ;;  %682 = vmatpush.msra.mxu3 %v1538_v30 }
 0x175   :  { %623 = vmatpush.msra.mxu0 %v1530_v27  ;;  %643 = vmatpush.msra.mxu1 %v1532_v28 }
 0x176   :  { %663 = vmatpush.msra.mxu2 %v1536_v29  ;;  %683 = vmatpush.msra.mxu3 %v1550_v34 }
 0x177   :  { %624 = vmatpush.msra.mxu0 %v1542_v31  ;;  %644 = vmatpush.msra.mxu1 %v1544_v32 }
 0x178   :  { %664 = vmatpush.msra.mxu2 %v1548_v33  ;;  %684 = vmatpush.msra.mxu3 %v1562_v38 }
 0x179   :  { %625 = vmatpush.msra.mxu0 %v1554_v35  ;;  %645 = vmatpush.msra.mxu1 %v1556_v36 }
 0x17a   :  { %665 = vmatpush.msra.mxu2 %v1560_v37  ;;  %685 = vmatpush.msra.mxu3 %v1574_v42 }
 0x17b   :  { %626 = vmatpush.msra.mxu0 %v1566_v39  ;;  %646 = vmatpush.msra.mxu1 %v1568_v40 }
 0x17c   :  { %666 = vmatpush.msra.mxu2 %v1572_v41  ;;  %686 = vmatpush.msra.mxu3 %v2363_v0 }
 0x17d   :  { %627 = vmatpush.msra.mxu0 %v2364_v1  ;;  %647 = vmatpush.msra.mxu1 %v2365_v2 }
 0x17e   :  { %667 = vmatpush.msra.mxu2 %v2366_v3  ;;  %687 = vmatpush.msra.mxu3 %v2367_v4 }
 0x17f   :  { %628 = vmatpush.msra.mxu0 %v2368_v5  ;;  %648 = vmatpush.msra.mxu1 %v2369_v6 }
 0x180   :  { %668 = vmatpush.msra.mxu2 %v2370_v7  ;;  %688 = vmatpush.msra.mxu3 %v2371_v56 }
 0x181   :  { %629 = vmatpush.msra.mxu0 %v2372_v43  ;;  %649 = vmatpush.msra.mxu1 %v2373_v44 }
 0x182   :  { %669 = vmatpush.msra.mxu2 %v2374_v45  ;;  %689 = vmatpush.msra.mxu3 %v2375_v63 }
 0x183   :  { %630 = vmatpush.msra.mxu0 %v2376_v48  ;;  %650 = vmatpush.msra.mxu1 %v2377_v49  ;;  %v387_v49 = vld [vmem:[#allocation4 + $0x28] sm:$0xff] }
 0x184   :  { %670 = vmatpush.msra.mxu2 %v2378_v57  ;;  %690 = vmatpush.msra.mxu3 %v2379_v59  ;;  %v390_v63 = vunpack.c.l.bf16 %v387_v49  ;;  %v391_v59 = vunpack.c.h.bf16 %v387_v49 }
 0x185   :  { %631 = vmatpush.msra.mxu0 %v2380_v52  ;;  %651 = vmatpush.msra.mxu1 %v2381_v53 }
 0x186   :  { %671 = vmatpush.msra.mxu2 %v2382_v61  ;;  %691 = vmatpush.msra.mxu3 %v2383_v62 }
 0x1e2   :  { %v409_v50 = vpop.f32.mrf.mxu0  ;;  %v429_v54 = vpop.f32.mrf.mxu1 }
 0x1e3   :  { %v472_v46 = vadd.f32 %v409_v50, %v388_v58  ;;  %v473_v47 = vadd.f32 %v429_v54, %v389_v51 }
 0x1e5   :  { %v476_v48 = vmul.f32 0.5, %v472_v46  ;;  %v477_v57 = vmul.f32 0.5, %v473_v47 }
 0x1e7   :  { %1178 = vtanh.f32 %v476_v48 }
 0x1e8   :  { %1180 = vtanh.f32 %v477_v57 }
 0x1e9   :  { %v449_v52 = vpop.f32.mrf.mxu2  ;;  %v469_v53 = vpop.f32.mrf.mxu3 }
 0x1ea   :  { %v474_v45 = vadd.f32 %v449_v52, %v390_v63  ;;  %v475_v61 = vadd.f32 %v469_v53, %v391_v59  ;;  %v1925_v52 = vld [vmem:[#allocation7 + $0x1c8] sm:$0xff]  ;;  %v1928_v53 = vld [vmem:[#allocation7 + $0x1d0] sm:$0xff] }
 0x1ec   :  { %1182 = vtanh.f32 %v474_v45  ;;  %v479_v62 = vmul.f32 0.5, %v475_v61  ;;  %v1932_v61 = vld [vmem:[#allocation7 + $0x1a0] sm:$0xff] }
 0x1ed   :  { %v1179_v44 = vpop.eup %1178 }
 0x1ee   :  { %v1181_v43 = vpop.eup %1180  ;;  %v484_v60 = vmul.f32 0.5, %v1179_v44  ;;  %1184 = vtanh.f32 %v479_v62  ;;  %v1922_v44 = vld [vmem:[#allocation7 + $0x1c0] sm:$0xff]  ;;  %v1935_v62 = vld [vmem:[#allocation7 + $0x1a8] sm:$0xff] }
 0x1ef   :  { %v485_v56 = vmul.f32 0.5, %v1181_v43  ;;  %v1912_v43 = vld [vmem:[#allocation7 + $0x1e0] sm:$0xff] }
 0x1f0   :  { %v488_v58 = vadd.f32 0.5, %v484_v60 }
 0x1f1   :  { %v489_v51 = vadd.f32 0.5, %v485_v56  ;;  %v1915_v56 = vld [vmem:[#allocation7 + $0x1e8] sm:$0xff] }
 0x1f2   :  { %v1183_v50 = vpop.eup %1182 }
 0x1f3   :  { %v492_v54 = vmul.f32 %v489_v51, %v1841_v55  ;;  %v493_v46 = vmul.f32 %v1183_v50, %v488_v58  ;;  %v1918_v55 = vld [vmem:[#allocation7 + $0x1f0] sm:$0xff]  ;;  %v1999_v58 = vld [vmem:[#allocation7 + $0x1f8] sm:$0xff] }
 0x1f4   :  { %v1185_v49 = vpop.eup %1184  ;;  %v2005_v51 = vld [vmem:[#allocation7 + $0x1d8] sm:$0xff]  ;;  %v2010_v50 = vld [vmem:[#allocation7 + $0x1b0] sm:$0xff] }
 0x1f5   :  { %v1909_v48 = vadd.f32 %v493_v46, %v492_v54  ;;  %v487_v63 = vmul.f32 0.5, %v1185_v49  ;;  %v2013_v54 = vld [vmem:[#allocation7 + $0x1b8] sm:$0xff]  ;;  %v2016_v46 = vld [vmem:[#allocation7 + $0x180] sm:$0xff]  ;;  %v2019_v49 = vld [vmem:[#allocation7 + $0x188] sm:$0xff] }
 0x1f7   :  { %1186 = vtanh.f32 %v1909_v48  ;;  %v491_v57 = vadd.f32 0.5, %v487_v63  ;;  %v2025_v63 = vld [vmem:[#allocation7 + $0x198] sm:$0xff] }
 0x1fd   :  { %v1187_v45 = vpop.eup %1186 }
 0x1fe   :  { %v496_v59 = vmul.f32 %v1187_v45, %v491_v57  ;;  %v2028_v57 = vld [vmem:[#allocation7 + $0x160] sm:$0xff]  ;;  %v2031_v45 = vld [vmem:[#allocation7 + $0x168] sm:$0xff] }
 0x200   :  { %520 = vmatmul.f32.vlgmr.msrb.gmra.mxu0 %v496_v59  ;;  %540 = vmatmul.f32.vlgmr.msrb.gmra.mxu1 %v496_v59 }
 0x201   :  { %560 = vmatmul.f32.vlgmr.msrb.gmra.mxu2 %v496_v59  ;;  %580 = vmatmul.f32.vlgmr.msrb.gmra.mxu3 %v496_v59  ;;  %v2034_v59 = vld [vmem:[#allocation7 + $0x170] sm:$0xff] }
 0x202   :  { %728 = vmatpush.msrb.mxu0 %v1912_v43  ;;  %748 = vmatpush.msrb.mxu1 %v1915_v56 }
 0x203   :  { %768 = vmatpush.msrb.mxu2 %v1918_v55  ;;  %788 = vmatpush.msrb.mxu3 %v1476_v9  ;;  %v2385_v9 = vld [vmem:[#allocation22_spill] sm:$0xff] }
 0x204   :  { %729 = vmatpush.msrb.mxu0 %v1922_v44  ;;  %749 = vmatpush.msrb.mxu1 %v1925_v52 }
 0x205   :  { %769 = vmatpush.msrb.mxu2 %v1928_v53  ;;  %789 = vmatpush.msrb.mxu3 %v1484_v12  ;;  %v2388_v12 = vld [vmem:[#allocation29_spill] sm:$0xff] }
 0x206   :  { %730 = vmatpush.msrb.mxu0 %v1932_v61  ;;  %750 = vmatpush.msrb.mxu1 %v1935_v62 }
 0x207   :  { %770 = vmatpush.msrb.mxu2 %v1474_v8  ;;  %790 = vmatpush.msrb.mxu3 %v1490_v14  ;;  %v2384_v8 = vld [vmem:[#allocation25_spill] sm:$0xff]  ;;  %v2390_v14 = vld [vmem:[#allocation27_spill] sm:$0xff] }
 0x208   :  { %731 = vmatpush.msrb.mxu0 %v1480_v10  ;;  %751 = vmatpush.msrb.mxu1 %v1482_v11  ;;  %v2386_v10 = vld [vmem:[#allocation23_spill] sm:$0xff]  ;;  %v2387_v11 = vld [vmem:[#allocation24_spill] sm:$0xff] }
 0x209   :  { %771 = vmatpush.msrb.mxu2 %v1488_v13  ;;  %791 = vmatpush.msrb.mxu3 %v1502_v18  ;;  %v2389_v13 = vld [vmem:[#allocation26_spill] sm:$0xff]  ;;  %v2394_v18 = vld [vmem:[#allocation31_spill] sm:$0xff] }
 0x20a   :  { %732 = vmatpush.msrb.mxu0 %v1494_v15  ;;  %752 = vmatpush.msrb.mxu1 %v1496_v16  ;;  %v2391_v15 = vld [vmem:[#allocation28_spill] sm:$0xff]  ;;  %v2392_v16 = vld [vmem:[#allocation33_spill] sm:$0xff] }
 0x20b   :  { %772 = vmatpush.msrb.mxu2 %v1500_v17  ;;  %792 = vmatpush.msrb.mxu3 %v1514_v22  ;;  %v2393_v17 = vld [vmem:[#allocation30_spill] sm:$0xff] }
 0x20c   :  { %733 = vmatpush.msrb.mxu0 %v1506_v19  ;;  %753 = vmatpush.msrb.mxu1 %v1508_v20  ;;  %v2395_v19 = vld [vmem:[#allocation32_spill] sm:$0xff]  ;;  %v2396_v20 = vld [vmem:[#allocation34_spill] sm:$0xff] }
 0x20d   :  { %773 = vmatpush.msrb.mxu2 %v1512_v21  ;;  %793 = vmatpush.msrb.mxu3 %v1526_v26  ;;  %v498_v21 = vld [vmem:[#allocation4 + $0x30] sm:$0xff] }
 0x20e   :  { %734 = vmatpush.msrb.mxu0 %v1518_v23  ;;  %754 = vmatpush.msrb.mxu1 %v1520_v24  ;;  %v500_v22 = vunpack.c.l.bf16 %v498_v21  ;;  %v501_v23 = vunpack.c.h.bf16 %v498_v21  ;;  %v2076_v21 = vld [vmem:[#allocation7 + $0xe0] sm:$0xff] }
 0x20f   :  { %774 = vmatpush.msrb.mxu2 %v1524_v25  ;;  %794 = vmatpush.msrb.mxu3 %v1538_v30 }
 0x210   :  { %735 = vmatpush.msrb.mxu0 %v1530_v27  ;;  %755 = vmatpush.msrb.mxu1 %v1532_v28  ;;  %v499_v28 = vld [vmem:[#allocation4 + $0x38] sm:$0xff] }
 0x211   :  { %775 = vmatpush.msrb.mxu2 %v1536_v29  ;;  %795 = vmatpush.msrb.mxu3 %v1550_v34 }
 0x212   :  { %736 = vmatpush.msrb.mxu0 %v1542_v31  ;;  %756 = vmatpush.msrb.mxu1 %v1544_v32  ;;  %v502_v31 = vunpack.c.l.bf16 %v499_v28  ;;  %v503_v32 = vunpack.c.h.bf16 %v499_v28  ;;  %v2097_v28 = vld [vmem:[#allocation7 + $0xd8] sm:$0xff] }
 0x213   :  { %776 = vmatpush.msrb.mxu2 %v1548_v33  ;;  %796 = vmatpush.msrb.mxu3 %v1562_v38 }
 0x214   :  { %737 = vmatpush.msrb.mxu0 %v1554_v35  ;;  %757 = vmatpush.msrb.mxu1 %v1556_v36 }
 0x215   :  { %777 = vmatpush.msrb.mxu2 %v1560_v37  ;;  %797 = vmatpush.msrb.mxu3 %v1574_v42 }
 0x216   :  { %738 = vmatpush.msrb.mxu0 %v1566_v39  ;;  %758 = vmatpush.msrb.mxu1 %v1568_v40 }
 0x217   :  { %778 = vmatpush.msrb.mxu2 %v1572_v41  ;;  %798 = vmatpush.msrb.mxu3 %v2363_v0 }
 0x218   :  { %739 = vmatpush.msrb.mxu0 %v2364_v1  ;;  %759 = vmatpush.msrb.mxu1 %v2365_v2 }
 0x219   :  { %779 = vmatpush.msrb.mxu2 %v2366_v3  ;;  %799 = vmatpush.msrb.mxu3 %v2367_v4 }
 0x21a   :  { %740 = vmatpush.msrb.mxu0 %v2368_v5  ;;  %760 = vmatpush.msrb.mxu1 %v2369_v6 }
 0x21b   :  { %780 = vmatpush.msrb.mxu2 %v2370_v7  ;;  %800 = vmatpush.msrb.mxu3 %v2384_v8  ;;  %v2037_v8 = vld [vmem:[#allocation7 + $0x178] sm:$0xff] }
 0x21c   :  { %741 = vmatpush.msrb.mxu0 %v2385_v9  ;;  %761 = vmatpush.msrb.mxu1 %v2386_v10  ;;  %v2040_v9 = vld [vmem:[#allocation7 + $0x140] sm:$0xff]  ;;  %v2043_v10 = vld [vmem:[#allocation7 + $0x148] sm:$0xff] }
 0x21d   :  { %781 = vmatpush.msrb.mxu2 %v2387_v11  ;;  %801 = vmatpush.msrb.mxu3 %v2388_v12  ;;  %v2046_v11 = vld [vmem:[#allocation7 + $0x150] sm:$0xff]  ;;  %v2049_v12 = vld [vmem:[#allocation7 + $0x158] sm:$0xff] }
 0x21e   :  { %742 = vmatpush.msrb.mxu0 %v2389_v13  ;;  %762 = vmatpush.msrb.mxu1 %v2390_v14  ;;  %v2052_v13 = vld [vmem:[#allocation7 + $0x120] sm:$0xff]  ;;  %v2055_v14 = vld [vmem:[#allocation7 + $0x128] sm:$0xff] }
 0x21f   :  { %782 = vmatpush.msrb.mxu2 %v2391_v15  ;;  %802 = vmatpush.msrb.mxu3 %v2392_v16  ;;  %v2058_v15 = vld [vmem:[#allocation7 + $0x130] sm:$0xff]  ;;  %v2061_v16 = vld [vmem:[#allocation7 + $0x138] sm:$0xff] }
 0x220   :  { %743 = vmatpush.msrb.mxu0 %v2393_v17  ;;  %763 = vmatpush.msrb.mxu1 %v2394_v18  ;;  %v2064_v17 = vld [vmem:[#allocation7 + $0x100] sm:$0xff]  ;;  %v2067_v18 = vld [vmem:[#allocation7 + $0x108] sm:$0xff] }
 0x221   :  { %783 = vmatpush.msrb.mxu2 %v2395_v19  ;;  %803 = vmatpush.msrb.mxu3 %v2396_v20  ;;  %v2070_v19 = vld [vmem:[#allocation7 + $0x110] sm:$0xff]  ;;  %v2073_v20 = vld [vmem:[#allocation7 + $0x118] sm:$0xff] }
 0x27d   :  { %v521_v24 = vpop.f32.mrf.mxu0  ;;  %v541_v25 = vpop.f32.mrf.mxu1 }
 0x27e   :  { %v584_v26 = vadd.f32 %v521_v24, %v500_v22  ;;  %v585_v27 = vadd.f32 %v541_v25, %v501_v23  ;;  %v2079_v22 = vld [vmem:[#allocation7 + $0xe8] sm:$0xff]  ;;  %v2082_v23 = vld [vmem:[#allocation7 + $0xf0] sm:$0xff]  ;;  %v2085_v24 = vld [vmem:[#allocation7 + $0xf8] sm:$0xff] }
 0x27f   :  { %v2088_v25 = vld [vmem:[#allocation7 + $0xc0] sm:$0xff] }
 0x280   :  { %v588_v29 = vmul.f32 0.5, %v584_v26  ;;  %v589_v30 = vmul.f32 0.5, %v585_v27  ;;  %v2091_v26 = vld [vmem:[#allocation7 + $0xc8] sm:$0xff]  ;;  %v2094_v27 = vld [vmem:[#allocation7 + $0xd0] sm:$0xff] }
 0x282   :  { %1188 = vtanh.f32 %v588_v29  ;;  %v2100_v29 = vld [vmem:[#allocation7 + $0xa0] sm:$0xff] }
 0x283   :  { %1190 = vtanh.f32 %v589_v30  ;;  %v2103_v30 = vld [vmem:[#allocation7 + $0xa8] sm:$0xff] }
 0x284   :  { %v561_v33 = vpop.f32.mrf.mxu2  ;;  %v581_v34 = vpop.f32.mrf.mxu3 }
 0x285   :  { %v586_v35 = vadd.f32 %v561_v33, %v502_v31  ;;  %v587_v36 = vadd.f32 %v581_v34, %v503_v32  ;;  %v2106_v31 = vld [vmem:[#allocation7 + $0xb0] sm:$0xff]  ;;  %v2109_v32 = vld [vmem:[#allocation7 + $0xb8] sm:$0xff]  ;;  %v2112_v33 = vld [vmem:[#allocation7 + $0x80] sm:$0xff] }
 0x286   :  { %2397 = vst [vmem:[#allocation17_spill] sm:$0xff] %v2109_v32  ;;  %v2115_v34 = vld [vmem:[#allocation7 + $0x88] sm:$0xff] }
 0x287   :  { %1192 = vtanh.f32 %v586_v35  ;;  %v591_v37 = vmul.f32 0.5, %v587_v36  ;;  %2398 = vst [vmem:[#allocation14_spill] sm:$0xff] %v2112_v33  ;;  %v2118_v35 = vld [vmem:[#allocation7 + $0x90] sm:$0xff]  ;;  %v2121_v36 = vld [vmem:[#allocation7 + $0x98] sm:$0xff] }
 0x288   :  { %v1189_v38 = vpop.eup %1188  ;;  %2399 = vst [vmem:[#allocation15_spill] sm:$0xff] %v2115_v34 }
 0x289   :  { %v1191_v39 = vpop.eup %1190  ;;  %v596_v40 = vmul.f32 0.5, %v1189_v38  ;;  %1194 = vtanh.f32 %v591_v37  ;;  %2400 = vst [vmem:[#allocation16_spill] sm:$0xff] %v2118_v35  ;;  %v2124_v37 = vld [vmem:[#allocation7 + $0x60] sm:$0xff]  ;;  %v2127_v38 = vld [vmem:[#allocation7 + $0x68] sm:$0xff] }
 0x28a   :  { %v597_v41 = vmul.f32 0.5, %v1191_v39  ;;  %2401 = vst [vmem:[#allocation21_spill] sm:$0xff] %v2121_v36  ;;  %v2130_v39 = vld [vmem:[#allocation7 + $0x70] sm:$0xff] }
 0x28b   :  { %v600_v42 = vadd.f32 0.5, %v596_v40  ;;  %2402 = vst [vmem:[#allocation18_spill] sm:$0xff] %v2124_v37  ;;  %v2133_v40 = vld [vmem:[#allocation7 + $0x78] sm:$0xff] }
 0x28c   :  { %v601_v0 = vadd.f32 0.5, %v597_v41  ;;  %2403 = vst [vmem:[#allocation19_spill] sm:$0xff] %v2127_v38  ;;  %v2136_v41 = vld [vmem:[#allocation7 + $0x40] sm:$0xff] }
 0x28d   :  { %v1193_v1 = vpop.eup %1192  ;;  %2404 = vst [vmem:[#allocation20_spill] sm:$0xff] %v2130_v39 }
 0x28e   :  { %v604_v2 = vmul.f32 %v601_v0, %v1909_v48  ;;  %v605_v3 = vmul.f32 %v1193_v1, %v600_v42  ;;  %v2022_v48 = vld [vmem:[#allocation7 + $0x190] sm:$0xff]  ;;  %2405 = vst [vmem:[#allocation25_spill] sm:$0xff] %v2133_v40  ;;  %v2139_v42 = vld [vmem:[#allocation7 + $0x48] sm:$0xff]  ;;  %v2145_v1 = vld [vmem:[#allocation7 + $0x58] sm:$0xff] }
 0x28f   :  { %v1195_v4 = vpop.eup %1194  ;;  %2406 = vst [vmem:[#allocation22_spill] sm:$0xff] %v2136_v41  ;;  %v2142_v0 = vld [vmem:[#allocation7 + $0x50] sm:$0xff] }
 0x290   :  { %v1993_v5 = vadd.f32 %v605_v3, %v604_v2  ;;  %v599_v6 = vmul.f32 0.5, %v1195_v4  ;;  %2407 = vst [vmem:[#allocation23_spill] sm:$0xff] %v2139_v42  ;;  %v2148_v2 = vld [vmem:[#allocation7 + $0x20] sm:$0xff]  ;;  %v2151_v3 = vld [vmem:[#allocation7 + $0x28] sm:$0xff]  ;;  %v2154_v4 = vld [vmem:[#allocation7 + $0x30] sm:$0xff] }
 0x291   :  { %2408 = vst [vmem:[#allocation24_spill] sm:$0xff] %v2142_v0 }
 0x292   :  { %1196 = vtanh.f32 %v1993_v5  ;;  %v603_v7 = vadd.f32 0.5, %v599_v6  ;;  %2409 = vst [vmem:[#allocation29_spill] sm:$0xff] %v2145_v1  ;;  %v2157_v6 = vld [vmem:[#allocation7 + $0x38] sm:$0xff] }
 0x293   :  { %2410 = vst [vmem:[#allocation26_spill] sm:$0xff] %v2148_v2 }
 0x294   :  { %2411 = vst [vmem:[#allocation27_spill] sm:$0xff] %v2151_v3 }
 0x295   :  { %2412 = vst [vmem:[#allocation28_spill] sm:$0xff] %v2154_v4 }
 0x296   :  { %2413 = vst [vmem:[#allocation33_spill] sm:$0xff] %v2157_v6 }
 0x298   :  { %v1197_v47 = vpop.eup %1196 }
 0x299   :  { %v608_v60 = vmul.f32 %v1197_v47, %v603_v7  ;;  %v2160_v7 = vld [vmem:[#allocation7] sm:$0xff]  ;;  %v2163_v47 = vld [vmem:[#allocation7 + $0x8] sm:$0xff] }
 0x29a   :  { %2414 = vst [vmem:[#allocation30_spill] sm:$0xff] %v2160_v7 }
 0x29b   :  { %632 = vmatmul.f32.vlgmr.msra.gmra.mxu0 %v608_v60  ;;  %652 = vmatmul.f32.vlgmr.msra.gmra.mxu1 %v608_v60  ;;  %2415 = vst [vmem:[#allocation31_spill] sm:$0xff] %v2163_v47 }
 0x29c   :  { %672 = vmatmul.f32.vlgmr.msra.gmra.mxu2 %v608_v60  ;;  %692 = vmatmul.f32.vlgmr.msra.gmra.mxu3 %v608_v60  ;;  %v2166_v60 = vld [vmem:[#allocation7 + $0x10] sm:$0xff] }
 0x29d   :  { %840 = vmatpush.msra.mxu0 %v1912_v43  ;;  %860 = vmatpush.msra.mxu1 %v1915_v56  ;;  %2416 = vst [vmem:[#allocation32_spill] sm:$0xff] %v2166_v60 }
 0x29e   :  { %880 = vmatpush.msra.mxu2 %v1918_v55  ;;  %900 = vmatpush.msra.mxu3 %v1999_v58 }
 0x29f   :  { %841 = vmatpush.msra.mxu0 %v1922_v44  ;;  %861 = vmatpush.msra.mxu1 %v1925_v52 }
 0x2a0   :  { %881 = vmatpush.msra.mxu2 %v1928_v53  ;;  %901 = vmatpush.msra.mxu3 %v2005_v51 }
 0x2a1   :  { %842 = vmatpush.msra.mxu0 %v1932_v61  ;;  %862 = vmatpush.msra.mxu1 %v1935_v62 }
 0x2a2   :  { %882 = vmatpush.msra.mxu2 %v2010_v50  ;;  %902 = vmatpush.msra.mxu3 %v2013_v54 }
 0x2a3   :  { %843 = vmatpush.msra.mxu0 %v2016_v46  ;;  %863 = vmatpush.msra.mxu1 %v2019_v49 }
 0x2a4   :  { %883 = vmatpush.msra.mxu2 %v2022_v48  ;;  %903 = vmatpush.msra.mxu3 %v2025_v63 }
 0x2a5   :  { %844 = vmatpush.msra.mxu0 %v2028_v57  ;;  %864 = vmatpush.msra.mxu1 %v2031_v45 }
 0x2a6   :  { %884 = vmatpush.msra.mxu2 %v2034_v59  ;;  %904 = vmatpush.msra.mxu3 %v2037_v8 }
 0x2a7   :  { %845 = vmatpush.msra.mxu0 %v2040_v9  ;;  %865 = vmatpush.msra.mxu1 %v2043_v10 }
 0x2a8   :  { %885 = vmatpush.msra.mxu2 %v2046_v11  ;;  %905 = vmatpush.msra.mxu3 %v2049_v12 }
 0x2a9   :  { %846 = vmatpush.msra.mxu0 %v2052_v13  ;;  %866 = vmatpush.msra.mxu1 %v2055_v14 }
 0x2aa   :  { %886 = vmatpush.msra.mxu2 %v2058_v15  ;;  %906 = vmatpush.msra.mxu3 %v2061_v16 }
 0x2ab   :  { %847 = vmatpush.msra.mxu0 %v2064_v17  ;;  %867 = vmatpush.msra.mxu1 %v2067_v18 }
 0x2ac   :  { %887 = vmatpush.msra.mxu2 %v2070_v19  ;;  %907 = vmatpush.msra.mxu3 %v2073_v20 }
 0x2ad   :  { %848 = vmatpush.msra.mxu0 %v2076_v21  ;;  %868 = vmatpush.msra.mxu1 %v2079_v22 }
 0x2ae   :  { %888 = vmatpush.msra.mxu2 %v2082_v23  ;;  %908 = vmatpush.msra.mxu3 %v2085_v24 }
 0x2af   :  { %849 = vmatpush.msra.mxu0 %v2088_v25  ;;  %869 = vmatpush.msra.mxu1 %v2091_v26 }
 0x2b0   :  { %889 = vmatpush.msra.mxu2 %v2094_v27  ;;  %909 = vmatpush.msra.mxu3 %v2097_v28 }
 0x2b1   :  { %850 = vmatpush.msra.mxu0 %v2100_v29  ;;  %870 = vmatpush.msra.mxu1 %v2103_v30 }
 0x2b2   :  { %890 = vmatpush.msra.mxu2 %v2106_v31  ;;  %910 = vmatpush.msra.mxu3 %v2109_v32 }
 0x2b3   :  { %851 = vmatpush.msra.mxu0 %v2112_v33  ;;  %871 = vmatpush.msra.mxu1 %v2115_v34 }
 0x2b4   :  { %891 = vmatpush.msra.mxu2 %v2118_v35  ;;  %911 = vmatpush.msra.mxu3 %v2121_v36 }
 0x2b5   :  { %852 = vmatpush.msra.mxu0 %v2124_v37  ;;  %872 = vmatpush.msra.mxu1 %v2127_v38 }
 0x2b6   :  { %892 = vmatpush.msra.mxu2 %v2130_v39  ;;  %912 = vmatpush.msra.mxu3 %v2133_v40 }
 0x2b7   :  { %853 = vmatpush.msra.mxu0 %v2136_v41  ;;  %873 = vmatpush.msra.mxu1 %v2139_v42 }
 0x2b8   :  { %893 = vmatpush.msra.mxu2 %v2142_v0  ;;  %913 = vmatpush.msra.mxu3 %v2145_v1 }
 0x2b9   :  { %854 = vmatpush.msra.mxu0 %v2148_v2  ;;  %874 = vmatpush.msra.mxu1 %v2151_v3  ;;  %v2169_v3 = vld [vmem:[#allocation7 + $0x18] sm:$0xff] }
 0x2ba   :  { %894 = vmatpush.msra.mxu2 %v2154_v4  ;;  %914 = vmatpush.msra.mxu3 %v2157_v6  ;;  %2417 = vst [vmem:[#allocation34_spill] sm:$0xff] %v2169_v3  ;;  %v610_v4 = vld [vmem:[#allocation4 + $0x40] sm:$0xff] }
 0x2bb   :  { %855 = vmatpush.msra.mxu0 %v2160_v7  ;;  %875 = vmatpush.msra.mxu1 %v2163_v47  ;;  %v612_v2 = vunpack.c.l.bf16 %v610_v4  ;;  %v613_v1 = vunpack.c.h.bf16 %v610_v4  ;;  %v611_v7 = vld [vmem:[#allocation4 + $0x48] sm:$0xff] }
 0x2bc   :  { %895 = vmatpush.msra.mxu2 %v2166_v60  ;;  %915 = vmatpush.msra.mxu3 %v2169_v3  ;;  %v614_v38 = vunpack.c.l.bf16 %v611_v7  ;;  %v615_v47 = vunpack.c.h.bf16 %v611_v7 }
 0x318   :  { %v633_v6 = vpop.f32.mrf.mxu0  ;;  %v653_v0 = vpop.f32.mrf.mxu1 }
 0x319   :  { %v696_v42 = vadd.f32 %v633_v6, %v612_v2  ;;  %v697_v41 = vadd.f32 %v653_v0, %v613_v1 }
 0x31b   :  { %v700_v40 = vmul.f32 0.5, %v696_v42  ;;  %v701_v39 = vmul.f32 0.5, %v697_v41 }
 0x31d   :  { %1198 = vtanh.f32 %v700_v40 }
 0x31e   :  { %1200 = vtanh.f32 %v701_v39 }
 0x31f   :  { %v673_v37 = vpop.f32.mrf.mxu2  ;;  %v693_v60 = vpop.f32.mrf.mxu3 }
 0x320   :  { %v698_v36 = vadd.f32 %v673_v37, %v614_v38  ;;  %v699_v35 = vadd.f32 %v693_v60, %v615_v47 }
 0x322   :  { %1202 = vtanh.f32 %v698_v36  ;;  %v703_v3 = vmul.f32 0.5, %v699_v35 }
 0x323   :  { %v1199_v34 = vpop.eup %1198 }
 0x324   :  { %v1201_v33 = vpop.eup %1200  ;;  %v708_v4 = vmul.f32 0.5, %v1199_v34  ;;  %1204 = vtanh.f32 %v703_v3 }
 0x325   :  { %v709_v32 = vmul.f32 0.5, %v1201_v33 }
 0x326   :  { %v712_v2 = vadd.f32 0.5, %v708_v4 }
 0x327   :  { %v713_v0 = vadd.f32 0.5, %v709_v32 }
 0x328   :  { %v1203_v1 = vpop.eup %1202 }
 0x329   :  { %v716_v41 = vmul.f32 %v713_v0, %v1993_v5  ;;  %v717_v42 = vmul.f32 %v1203_v1, %v712_v2  ;;  %v2426_v5 = vld [vmem:[#allocation25_spill] sm:$0xff] }
 0x32a   :  { %v1205_v6 = vpop.eup %1204  ;;  %v834_v2 = vld [vmem:[#allocation4 + $0x60] sm:$0xff] }
 0x32b   :  { %v2173_v40 = vadd.f32 %v717_v42, %v716_v41  ;;  %v711_v37 = vmul.f32 0.5, %v1205_v6  ;;  %v836_v0 = vunpack.c.l.bf16 %v834_v2  ;;  %v837_v1 = vunpack.c.h.bf16 %v834_v2  ;;  %v1078_v41 = vld [vmem:[#allocation9 + $0x78] sm:$0xff] }
 0x32d   :  { %1206 = vtanh.f32 %v2173_v40  ;;  %v715_v38 = vadd.f32 0.5, %v711_v37 }
 0x333   :  { %v1207_v36 = vpop.eup %1206 }
 0x334   :  { %v720_v35 = vmul.f32 %v1207_v36, %v715_v38  ;;  %v835_v38 = vld [vmem:[#allocation4 + $0x68] sm:$0xff] }
 0x336   :  { %744 = vmatmul.f32.vlgmr.msrb.gmra.mxu0 %v720_v35  ;;  %764 = vmatmul.f32.vlgmr.msrb.gmra.mxu1 %v720_v35 }
 0x337   :  { %784 = vmatmul.f32.vlgmr.msrb.gmra.mxu2 %v720_v35  ;;  %804 = vmatmul.f32.vlgmr.msrb.gmra.mxu3 %v720_v35 }
 0x338   :  { %952 = vmatpush.msrb.mxu0 %v1912_v43  ;;  %972 = vmatpush.msrb.mxu1 %v1915_v56  ;;  %v2418_v43 = vld [vmem:[#allocation17_spill] sm:$0xff]  ;;  %v2419_v56 = vld [vmem:[#allocation14_spill] sm:$0xff] }
 0x339   :  { %992 = vmatpush.msrb.mxu2 %v1918_v55  ;;  %1012 = vmatpush.msrb.mxu3 %v1999_v58  ;;  %v2420_v55 = vld [vmem:[#allocation15_spill] sm:$0xff]  ;;  %v2427_v58 = vld [vmem:[#allocation22_spill] sm:$0xff] }
 0x33a   :  { %953 = vmatpush.msrb.mxu0 %v1922_v44  ;;  %973 = vmatpush.msrb.mxu1 %v1925_v52  ;;  %v2421_v44 = vld [vmem:[#allocation16_spill] sm:$0xff]  ;;  %v2422_v52 = vld [vmem:[#allocation21_spill] sm:$0xff] }
 0x33b   :  { %993 = vmatpush.msrb.mxu2 %v1928_v53  ;;  %1013 = vmatpush.msrb.mxu3 %v2005_v51  ;;  %v2423_v53 = vld [vmem:[#allocation18_spill] sm:$0xff]  ;;  %v2428_v51 = vld [vmem:[#allocation23_spill] sm:$0xff] }
 0x33c   :  { %954 = vmatpush.msrb.mxu0 %v1932_v61  ;;  %974 = vmatpush.msrb.mxu1 %v1935_v62  ;;  %v2424_v61 = vld [vmem:[#allocation19_spill] sm:$0xff]  ;;  %v2425_v62 = vld [vmem:[#allocation20_spill] sm:$0xff] }
 0x33d   :  { %994 = vmatpush.msrb.mxu2 %v2010_v50  ;;  %1014 = vmatpush.msrb.mxu3 %v2013_v54  ;;  %v2429_v50 = vld [vmem:[#allocation24_spill] sm:$0xff]  ;;  %v2430_v54 = vld [vmem:[#allocation29_spill] sm:$0xff] }
 0x33e   :  { %955 = vmatpush.msrb.mxu0 %v2016_v46  ;;  %975 = vmatpush.msrb.mxu1 %v2019_v49  ;;  %v2431_v46 = vld [vmem:[#allocation26_spill] sm:$0xff]  ;;  %v2432_v49 = vld [vmem:[#allocation27_spill] sm:$0xff] }
 0x33f   :  { %995 = vmatpush.msrb.mxu2 %v2022_v48  ;;  %1015 = vmatpush.msrb.mxu3 %v2025_v63  ;;  %v2433_v48 = vld [vmem:[#allocation28_spill] sm:$0xff]  ;;  %v2434_v63 = vld [vmem:[#allocation33_spill] sm:$0xff] }
 0x340   :  { %956 = vmatpush.msrb.mxu0 %v2028_v57  ;;  %976 = vmatpush.msrb.mxu1 %v2031_v45  ;;  %v2435_v57 = vld [vmem:[#allocation30_spill] sm:$0xff]  ;;  %v2436_v45 = vld [vmem:[#allocation31_spill] sm:$0xff] }
 0x341   :  { %996 = vmatpush.msrb.mxu2 %v2034_v59  ;;  %1016 = vmatpush.msrb.mxu3 %v2037_v8  ;;  %v2437_v59 = vld [vmem:[#allocation32_spill] sm:$0xff]  ;;  %v2438_v8 = vld [vmem:[#allocation34_spill] sm:$0xff] }
 0x342   :  { %957 = vmatpush.msrb.mxu0 %v2040_v9  ;;  %977 = vmatpush.msrb.mxu1 %v2043_v10  ;;  %v722_v9 = vld [vmem:[#allocation4 + $0x50] sm:$0xff] }
 0x343   :  { %997 = vmatpush.msrb.mxu2 %v2046_v11  ;;  %1017 = vmatpush.msrb.mxu3 %v2049_v12  ;;  %v724_v10 = vunpack.c.l.bf16 %v722_v9  ;;  %v725_v11 = vunpack.c.h.bf16 %v722_v9 }
 0x344   :  { %958 = vmatpush.msrb.mxu0 %v2052_v13  ;;  %978 = vmatpush.msrb.mxu1 %v2055_v14 }
 0x345   :  { %998 = vmatpush.msrb.mxu2 %v2058_v15  ;;  %1018 = vmatpush.msrb.mxu3 %v2061_v16  ;;  %v723_v16 = vld [vmem:[#allocation4 + $0x58] sm:$0xff] }
 0x346   :  { %959 = vmatpush.msrb.mxu0 %v2064_v17  ;;  %979 = vmatpush.msrb.mxu1 %v2067_v18 }
 0x347   :  { %999 = vmatpush.msrb.mxu2 %v2070_v19  ;;  %1019 = vmatpush.msrb.mxu3 %v2073_v20  ;;  %v726_v19 = vunpack.c.l.bf16 %v723_v16  ;;  %v727_v20 = vunpack.c.h.bf16 %v723_v16  ;;  %v1071_v16 = vld [vmem:[#allocation9 + $0x40] sm:$0xff] }
 0x348   :  { %960 = vmatpush.msrb.mxu0 %v2076_v21  ;;  %980 = vmatpush.msrb.mxu1 %v2079_v22 }
 0x349   :  { %1000 = vmatpush.msrb.mxu2 %v2082_v23  ;;  %1020 = vmatpush.msrb.mxu3 %v2085_v24 }
 0x34a   :  { %961 = vmatpush.msrb.mxu0 %v2088_v25  ;;  %981 = vmatpush.msrb.mxu1 %v2091_v26 }
 0x34b   :  { %1001 = vmatpush.msrb.mxu2 %v2094_v27  ;;  %1021 = vmatpush.msrb.mxu3 %v2097_v28 }
 0x34c   :  { %962 = vmatpush.msrb.mxu0 %v2100_v29  ;;  %982 = vmatpush.msrb.mxu1 %v2103_v30 }
 0x34d   :  { %1002 = vmatpush.msrb.mxu2 %v2106_v31  ;;  %1022 = vmatpush.msrb.mxu3 %v2418_v43  ;;  %v838_v43 = vunpack.c.l.bf16 %v835_v38 }
 0x34e   :  { %963 = vmatpush.msrb.mxu0 %v2419_v56  ;;  %983 = vmatpush.msrb.mxu1 %v2420_v55  ;;  %v839_v56 = vunpack.c.h.bf16 %v835_v38 }
 0x34f   :  { %1003 = vmatpush.msrb.mxu2 %v2421_v44  ;;  %1023 = vmatpush.msrb.mxu3 %v2422_v52 }
 0x350   :  { %964 = vmatpush.msrb.mxu0 %v2423_v53  ;;  %984 = vmatpush.msrb.mxu1 %v2424_v61 }
 0x351   :  { %1004 = vmatpush.msrb.mxu2 %v2425_v62  ;;  %1024 = vmatpush.msrb.mxu3 %v2426_v5 }
 0x352   :  { %965 = vmatpush.msrb.mxu0 %v2427_v58  ;;  %985 = vmatpush.msrb.mxu1 %v2428_v51 }
 0x353   :  { %1005 = vmatpush.msrb.mxu2 %v2429_v50  ;;  %1025 = vmatpush.msrb.mxu3 %v2430_v54 }
 0x354   :  { %966 = vmatpush.msrb.mxu0 %v2431_v46  ;;  %986 = vmatpush.msrb.mxu1 %v2432_v49 }
 0x355   :  { %1006 = vmatpush.msrb.mxu2 %v2433_v48  ;;  %1026 = vmatpush.msrb.mxu3 %v2434_v63 }
 0x356   :  { %967 = vmatpush.msrb.mxu0 %v2435_v57  ;;  %987 = vmatpush.msrb.mxu1 %v2436_v45 }
 0x357   :  { %1007 = vmatpush.msrb.mxu2 %v2437_v59  ;;  %1027 = vmatpush.msrb.mxu3 %v2438_v8 }
 0x3b3   :  { %v745_v12 = vpop.f32.mrf.mxu0  ;;  %v765_v13 = vpop.f32.mrf.mxu1 }
 0x3b4   :  { %v808_v14 = vadd.f32 %v745_v12, %v724_v10  ;;  %v809_v15 = vadd.f32 %v765_v13, %v725_v11  ;;  %v1077_v10 = vld [vmem:[#allocation9 + $0x70] sm:$0xff]  ;;  %v1076_v11 = vld [vmem:[#allocation9 + $0x68] sm:$0xff]  ;;  %v1075_v12 = vld [vmem:[#allocation9 + $0x60] sm:$0xff] }
 0x3b5   :  { %v1074_v13 = vld [vmem:[#allocation9 + $0x58] sm:$0xff] }
 0x3b6   :  { %v812_v17 = vmul.f32 0.5, %v808_v14  ;;  %v813_v18 = vmul.f32 0.5, %v809_v15  ;;  %v1073_v14 = vld [vmem:[#allocation9 + $0x50] sm:$0xff]  ;;  %v1072_v15 = vld [vmem:[#allocation9 + $0x48] sm:$0xff] }
 0x3b8   :  { %1208 = vtanh.f32 %v812_v17  ;;  %v1070_v17 = vld [vmem:[#allocation9 + $0x38] sm:$0xff] }
 0x3b9   :  { %1210 = vtanh.f32 %v813_v18  ;;  %v1069_v18 = vld [vmem:[#allocation9 + $0x30] sm:$0xff] }
 0x3ba   :  { %v785_v21 = vpop.f32.mrf.mxu2  ;;  %v805_v22 = vpop.f32.mrf.mxu3 }
 0x3bb   :  { %v810_v23 = vadd.f32 %v785_v21, %v726_v19  ;;  %v811_v24 = vadd.f32 %v805_v22, %v727_v20  ;;  %v1068_v19 = vld [vmem:[#allocation9 + $0x28] sm:$0xff]  ;;  %v1067_v20 = vld [vmem:[#allocation9 + $0x20] sm:$0xff]  ;;  %v1066_v21 = vld [vmem:[#allocation9 + $0x18] sm:$0xff] }
 0x3bc   :  { %v1065_v22 = vld [vmem:[#allocation9 + $0x10] sm:$0xff] }
 0x3bd   :  { %1212 = vtanh.f32 %v810_v23  ;;  %v815_v25 = vmul.f32 0.5, %v811_v24  ;;  %v946_v23 = vld [vmem:[#allocation4 + $0x70] sm:$0xff]  ;;  %v1064_v24 = vld [vmem:[#allocation9 + $0x8] sm:$0xff] }
 0x3be   :  { %v1209_v26 = vpop.eup %1208 }
 0x3bf   :  { %v1211_v27 = vpop.eup %1210  ;;  %v820_v28 = vmul.f32 0.5, %v1209_v26  ;;  %1214 = vtanh.f32 %v815_v25  ;;  %v1063_v25 = vld [vmem:[#allocation9] sm:$0xff]  ;;  %v948_v26 = vunpack.c.l.bf16 %v946_v23 }
 0x3c0   :  { %v821_v29 = vmul.f32 0.5, %v1211_v27  ;;  %v949_v27 = vunpack.c.h.bf16 %v946_v23 }
 0x3c1   :  { %v824_v30 = vadd.f32 0.5, %v820_v28 }
 0x3c2   :  { %v825_v31 = vadd.f32 0.5, %v821_v29 }
 0x3c3   :  { %v1213_v32 = vpop.eup %1212 }
 0x3c4   :  { %v828_v33 = vmul.f32 %v825_v31, %v2173_v40  ;;  %v829_v34 = vmul.f32 %v1213_v32, %v824_v30  ;;  %v947_v32 = vld [vmem:[#allocation4 + $0x78] sm:$0xff] }
 0x3c5   :  { %v1215_v39 = vpop.eup %1214 }
 0x3c6   :  { %v830_v3 = vadd.f32 %v829_v34, %v828_v33  ;;  %v823_v7 = vmul.f32 0.5, %v1215_v39  ;;  %v950_v39 = vunpack.c.l.bf16 %v947_v32 }
 0x3c8   :  { %1216 = vtanh.f32 %v830_v3  ;;  %v827_v47 = vadd.f32 0.5, %v823_v7 }
 0x3ce   :  { %v1217_v60 = vpop.eup %1216 }
 0x3cf   :  { %v832_v4 = vmul.f32 %v1217_v60, %v827_v47 }
 0x3d1   :  { %856 = vmatmul.f32.vlgmr.msra.gmra.mxu0 %v832_v4  ;;  %876 = vmatmul.f32.vlgmr.msra.gmra.mxu1 %v832_v4 }
 0x3d2   :  { %896 = vmatmul.f32.vlgmr.msra.gmra.mxu2 %v832_v4  ;;  %916 = vmatmul.f32.vlgmr.msra.gmra.mxu3 %v832_v4 }
 0x3d3   :  { %1083 = vmatpush.msra.mxu0 %v1078_v41 }
 0x3d5   :  { %1084 = vmatpush.msra.mxu0 %v1077_v10 }
 0x3d7   :  { %1085 = vmatpush.msra.mxu0 %v1076_v11 }
 0x3d9   :  { %1086 = vmatpush.msra.mxu0 %v1075_v12 }
 0x3db   :  { %1087 = vmatpush.msra.mxu0 %v1074_v13 }
 0x3dd   :  { %1088 = vmatpush.msra.mxu0 %v1073_v14 }
 0x3df   :  { %1089 = vmatpush.msra.mxu0 %v1072_v15 }
 0x3e1   :  { %1090 = vmatpush.msra.mxu0 %v1071_v16 }
 0x3e3   :  { %1091 = vmatpush.msra.mxu0 %v1070_v17 }
 0x3e5   :  { %1092 = vmatpush.msra.mxu0 %v1069_v18 }
 0x3e7   :  { %1093 = vmatpush.msra.mxu0 %v1068_v19 }
 0x3e9   :  { %1094 = vmatpush.msra.mxu0 %v1067_v20 }
 0x3eb   :  { %1095 = vmatpush.msra.mxu0 %v1066_v21 }
 0x3ed   :  { %1096 = vmatpush.msra.mxu0 %v1065_v22 }
 0x3ef   :  { %1097 = vmatpush.msra.mxu0 %v1064_v24 }
 0x3f1   :  { %1098 = vmatpush.msra.mxu0 %v1063_v25 }
 0x44e   :  { %v857_v42 = vpop.f32.mrf.mxu0  ;;  %v877_v6 = vpop.f32.mrf.mxu1 }
 0x44f   :  { %v920_v40 = vadd.f32 %v857_v42, %v836_v0  ;;  %v921_v37 = vadd.f32 %v877_v6, %v837_v1 }
 0x451   :  { %v924_v36 = vmul.f32 0.5, %v920_v40  ;;  %v925_v35 = vmul.f32 0.5, %v921_v37 }
 0x453   :  { %1218 = vtanh.f32 %v924_v36 }
 0x454   :  { %1220 = vtanh.f32 %v925_v35 }
 0x455   :  { %v897_v55 = vpop.f32.mrf.mxu2  ;;  %v917_v44 = vpop.f32.mrf.mxu3 }
 0x456   :  { %v922_v52 = vadd.f32 %v897_v55, %v838_v43  ;;  %v923_v53 = vadd.f32 %v917_v44, %v839_v56 }
 0x458   :  { %1222 = vtanh.f32 %v922_v52  ;;  %v927_v61 = vmul.f32 0.5, %v923_v53  ;;  %v135_v53 = vlaneseq }
 0x459   :  { %v1219_v62 = vpop.eup %1218 }
 0x45a   :  { %v1221_v5 = vpop.eup %1220  ;;  %v932_v58 = vmul.f32 0.5, %v1219_v62  ;;  %1224 = vtanh.f32 %v927_v61  ;;  %v136_v61 = vand.u32 127, %v135_v53  ;;  %v1157_v62 = vld [vmem:[%s2254_s3] ss:$0 sm:$0xff]  ;;  %s1418_s3 = smov [#allocation10]  }
 0x45b   :  { %v933_v51 = vmul.f32 0.5, %v1221_v5  ;;  %s1133_s9 = sshll.u32 %s1418_s3, 4  ;;  %s1134_s9 = int_to_ptr.vmem [resolvable:$true] %s1133_s9 }
 0x45c   :  { %v936_v50 = vadd.f32 0.5, %v932_v58  ;;  %vm1103_vm0 = vcmp.lt.s32.totalorder %v136_v61, 5 }
 0x45d   :  { %v937_v54 = vadd.f32 0.5, %v933_v51 }
 0x45e   :  { %v1223_v46 = vpop.eup %1222 }
 0x45f   :  { %v940_v49 = vmul.f32 %v937_v54, %v830_v3  ;;  %v941_v48 = vmul.f32 %v1223_v46, %v936_v50  ;;  %v951_v3 = vunpack.c.h.bf16 %v947_v32 }
 0x460   :  { %v1225_v63 = vpop.eup %1224 }
 0x461   :  { %v2241_v57 = vadd.f32 %v941_v48, %v940_v49  ;;  %v935_v45 = vmul.f32 0.5, %v1225_v63 }
 0x463   :  { %1226 = vtanh.f32 %v2241_v57  ;;  %v939_v59 = vadd.f32 0.5, %v935_v45 }
 0x469   :  { %v1227_v8 = vpop.eup %1226 }
 0x46a   :  { %v944_v9 = vmul.f32 %v1227_v8, %v939_v59 }
 0x46c   :  { %968 = vmatmul.f32.vlgmr.msrb.gmra.mxu0 %v944_v9  ;;  %988 = vmatmul.f32.vlgmr.msrb.gmra.mxu1 %v944_v9 }
 0x46d   :  { %1008 = vmatmul.f32.vlgmr.msrb.gmra.mxu2 %v944_v9  ;;  %1028 = vmatmul.f32.vlgmr.msrb.gmra.mxu3 %v944_v9 }
 0x4e9   :  { %v969_v28 = vpop.f32.mrf.mxu0  ;;  %v989_v29 = vpop.f32.mrf.mxu1 }
 0x4ea   :  { %v1032_v30 = vadd.f32 %v969_v28, %v948_v26  ;;  %v1033_v31 = vadd.f32 %v989_v29, %v949_v27 }
 0x4ec   :  { %v1036_v33 = vmul.f32 0.5, %v1032_v30  ;;  %v1037_v34 = vmul.f32 0.5, %v1033_v31 }
 0x4ee   :  { %1228 = vtanh.f32 %v1036_v33 }
 0x4ef   :  { %1230 = vtanh.f32 %v1037_v34 }
 0x4f0   :  { %v1009_v7 = vpop.f32.mrf.mxu2  ;;  %v1029_v47 = vpop.f32.mrf.mxu3 }
 0x4f1   :  { %v1034_v60 = vadd.f32 %v1009_v7, %v950_v39  ;;  %v1035_v4 = vadd.f32 %v1029_v47, %v951_v3 }
 0x4f3   :  { %1232 = vtanh.f32 %v1034_v60  ;;  %v1039_v2 = vmul.f32 0.5, %v1035_v4 }
 0x4f4   :  { %v1229_v0 = vpop.eup %1228 }
 0x4f5   :  { %v1231_v1 = vpop.eup %1230  ;;  %v1044_v41 = vmul.f32 0.5, %v1229_v0  ;;  %1234 = vtanh.f32 %v1039_v2 }
 0x4f6   :  { %v1045_v42 = vmul.f32 0.5, %v1231_v1 }
 0x4f7   :  { %v1048_v6 = vadd.f32 0.5, %v1044_v41 }
 0x4f8   :  { %v1049_v40 = vadd.f32 0.5, %v1045_v42 }
 0x4f9   :  { %v1233_v37 = vpop.eup %1232 }
 0x4fa   :  { %v1052_v38 = vmul.f32 %v1049_v40, %v2241_v57  ;;  %v1053_v36 = vmul.f32 %v1233_v37, %v1048_v6 }
 0x4fb   :  { %v1235_v35 = vpop.eup %1234 }
 0x4fc   :  { %v1054_v43 = vadd.f32 %v1053_v36, %v1052_v38  ;;  %v1047_v56 = vmul.f32 0.5, %v1235_v35 }
 0x4fe   :  { %1236 = vtanh.f32 %v1054_v43  ;;  %v1051_v55 = vadd.f32 0.5, %v1047_v56 }
 0x504   :  { %v1237_v44 = vpop.eup %1236 }
 0x505   :  { %v1056_v52 = vmul.f32 %v1237_v44, %v1051_v55 }
 0x507   :  { %1099 = vmatmul.f32.vlgmr.msra.gmra.mxu0 %v1056_v52 }
 0x584   :  { %v1100_v5 = vpop.f32.mrf.mxu0 }
 0x585   :  { %v1101_v58 = vadd.f32 %v1157_v62, %v1100_v5 }
 0x587   :  { %v1104_v51 = vsel %vm1103_vm0, %v1101_v58, -1e+30 }
 0x588   :  { %1105 = vmax.xlane.f32.xlu0 %v1104_v51 }
 0x5fb   :  { %v1106_v50 = vpop.xlane.xlu0 %1105 }
 0x5fc   :  { %v1107_v54 = vsub.f32 %v1104_v51, %v1106_v50 }
 0x5fe   :  { %v1108_v46 = vmul.f32 1.442695, %v1107_v54 }
 0x600   :  { %1238 = vpow2.f32 %v1108_v46 }
 0x606   :  { %v1239_v49 = vpop.eup %1238 }
 0x607   :  { %1110 = vadd.xlane.f32.xlu0 %v1239_v49 }
 0x67a   :  { %v1111_v48 = vpop.xlane.xlu0 %1110 }
 0x67b   :  { %1240 = vrcp.f32 %v1111_v48  ;;  %v1123_v59 = vand.u32 2147483648, %v1111_v48  ;;  %v1121_v9 = vand.u32 2147483647, %v1111_v48  ;;  %vm1117_vm2 = vweird.f32 %v1111_v48 }
 0x67d   :  { %v1124_v11 = vor.u32 1.1754944e-38, %v1123_v59  ;;  %vm1122_vm4 = vcmp.eq.f32.partialorder %v1121_v9, 8.507059e+37 }
 0x681   :  { %v1241_v63 = vpop.eup %1240 }
 0x682   :  { %v1113_v57 = vmul.f32 %v1241_v63, %v1111_v48  ;;  %vm1118_vm1 = vweird.f32 %v1241_v63 }
 0x683   :  { %vm1119_vm3 = vmor %vm1117_vm2, %vm1118_vm1 }
 0x684   :  { %v1114_v45 = vsub.f32 1.0, %v1113_v57 }
 0x686   :  { %v1115_v8 = vmul.f32 %v1241_v63, %v1114_v45 }
 0x688   :  { %v1116_v10 = vadd.f32 %v1241_v63, %v1115_v8 }
 0x68a   :  { %v1120_v12 = vsel %vm1119_vm3, %v1241_v63, %v1116_v10 }
 0x68b   :  { %v1125_v13 = vsel %vm1122_vm4, %v1124_v11, %v1120_v12 }
 0x68c   :  { %v1126_v14 = vmul.f32 %v1239_v49, %v1125_v13 }
 0x68e   :  { %1127 = vst [vmem:[#allocation10] sm:$0xff] %v1126_v14 }
 0x68f   :  { %1138 = dma.vmem_to_hbm [thread:$0]  %s1134_s9, 128, %s1136_s12, [#allocation6]  }
 0x690   :  { %1406 = dma.done.wait [#allocation6], 128  }
 0x691   :  { %1407 = vsyncadd [#allocation6], 4294967168 }
 0x692   :  { %1143 = vsyncpa [#allocation5], 1 }
 0x693   :  { %1144 = vsyncpa [#allocation8], 1 }
 0x694   :  { %1145 = vsyncpa [#allocation6], 1 }

</bundles_post_ra>
